<compile_context>
chip_gen: v7x
topology: tpu7x:2x2x1
jax: 0.10.0
libtpu: 0.0.40
codegen_flags: <defaults>
</compile_context>

<pallas_src>
import functools

import numpy as np
import jax
import jax.numpy as jnp
from jax import lax
from jax.experimental import pallas as pl
from jax.experimental.pallas import tpu as pltpu


# --------------------------------------------------------------------------
# Pallas kernel: one batch element per grid step.
# --------------------------------------------------------------------------
def attention_kernel(x_ref, wq_ref, wk_ref, wv_ref, bq_ref, bk_ref, bv_ref,
                     smat_ref, pew_ref, peb_ref, wp_ref, bp_ref, o_ref,
                     *, num_heads, key_dim, head_dim):
    x = x_ref[0]                                                  # (N, C)
    scale = key_dim ** -0.5

    # Fused qkv 1x1 conv + BN (weights pre-transposed & head-permuted in wrapper).
    q = jnp.dot(x, wq_ref[...], preferred_element_type=jnp.float32) + bq_ref[...]   # (N, nh*kd)
    k = jnp.dot(x, wk_ref[...], preferred_element_type=jnp.float32) + bk_ref[...]   # (N, nh*kd)
    v = jnp.dot(x, wv_ref[...], preferred_element_type=jnp.float32) + bv_ref[...]   # (N, C) head-major

    # Positional-encoding depthwise 3x3 conv + BN, expressed as 9 spatial-shift matmuls.
    pew = pew_ref[...]                                            # (9, C) per-tap channel weights
    pe = jnp.zeros_like(v) + peb_ref[...]                         # start from fused BN bias
    for t in range(9):
        shifted = jnp.dot(smat_ref[t], v, preferred_element_type=jnp.float32)       # (N, C)
        pe = pe + shifted * pew[t:t + 1, :]

    # proj 1x1 conv + BN applied to (attn_out + pe); heads are accumulated
    # directly into the projected result (no concatenate of head outputs).
    wp = wp_ref[...]                                              # (C_in, C_out), rows head-major
    out = jnp.dot(pe, wp, preferred_element_type=jnp.float32) + bp_ref[...]          # (N, C)

    for g in range(num_heads):
        qg = q[:, g * key_dim:(g + 1) * key_dim]                  # (N, kd)
        kg = k[:, g * key_dim:(g + 1) * key_dim]                  # (N, kd)
        vg = v[:, g * head_dim:(g + 1) * head_dim]                # (N, hd)

        s = lax.dot_general(qg, kg, (((1,), (1,)), ((), ())),
                            preferred_element_type=jnp.float32) * scale              # (N, N)
        s = s - jnp.max(s, axis=-1, keepdims=True)
        p = jnp.exp(s)
        inv_l = pl.reciprocal(jnp.sum(p, axis=-1, keepdims=True), approx=False)
        p = p * inv_l

        og = jnp.dot(p, vg, preferred_element_type=jnp.float32)                      # (N, hd)
        out = out + jnp.dot(og, wp[g * head_dim:(g + 1) * head_dim, :],
                            preferred_element_type=jnp.float32)

    o_ref[0] = out.astype(o_ref.dtype)


# --------------------------------------------------------------------------
# Host-side helpers (one-time weight prep, outside the kernel).
# --------------------------------------------------------------------------
def _fuse_bn_1x1(w, bn, eps=1e-5):
    gamma, beta, mean, var = bn
    s = gamma / jnp.sqrt(var + eps)
    return w * s[:, None], beta - mean * s


def _build_shift_matrices(H, W):
    """9 (N,N) 0/1 matrices implementing the zero-padded 3x3 spatial shifts."""
    N = H * W
    S = np.zeros((9, N, N), np.float32)
    for ky in range(3):
        for kx in range(3):
            t = ky * 3 + kx
            for y in range(H):
                for xw in range(W):
                    sy, sx = y + ky - 1, xw + kx - 1
                    if 0 <= sy < H and 0 <= sx < W:
                        S[t, y * W + xw, sy * W + sx] = 1.0
    return S


def attention_pallas(x_nchw, params, num_heads, attn_ratio=0.5):
    """x_nchw: (B, C, H, W) float32. Returns (B, C, H, W)."""
    qkv_w, qkv_bn, pe_w, pe_bn, proj_w, proj_bn = params
    B, C, H, W = x_nchw.shape
    N = H * W
    head_dim = C // num_heads
    key_dim = int(head_dim * attn_ratio)
    blk = 2 * key_dim + head_dim
    nh_kd = num_heads * key_dim

    # Fuse BN into qkv, permute rows to head-major q/k/v blocks, pre-transpose.
    wqkv_eff, bqkv_eff = _fuse_bn_1x1(qkv_w, qkv_bn)
    q_idx = np.concatenate([g * blk + np.arange(key_dim) for g in range(num_heads)])
    k_idx = np.concatenate([g * blk + key_dim + np.arange(key_dim) for g in range(num_heads)])
    v_idx = np.concatenate([g * blk + 2 * key_dim + np.arange(head_dim) for g in range(num_heads)])
    wq_t = jnp.transpose(wqkv_eff[q_idx])                     # (C, nh*kd)
    wk_t = jnp.transpose(wqkv_eff[k_idx])                     # (C, nh*kd)
    wv_t = jnp.transpose(wqkv_eff[v_idx])                     # (C, C)
    bq = bqkv_eff[q_idx].reshape(1, nh_kd)
    bk = bqkv_eff[k_idx].reshape(1, nh_kd)
    bv = bqkv_eff[v_idx].reshape(1, C)

    # Fuse BN into the depthwise pe conv; lay out taps as (9, C).
    s_pe = pe_bn[0] / jnp.sqrt(pe_bn[3] + 1e-5)
    pe_w_eff = pe_w[:, 0, :, :] * s_pe[:, None, None]         # (C, 3, 3)
    pe_w9 = jnp.transpose(pe_w_eff, (1, 2, 0)).reshape(9, C)
    pe_b = (pe_bn[1] - pe_bn[2] * s_pe).reshape(1, C)

    # Fuse BN into proj, pre-transpose.
    wp_eff, bp_eff = _fuse_bn_1x1(proj_w, proj_bn)
    wp_t = jnp.transpose(wp_eff)                              # (C, C)
    bp = bp_eff.reshape(1, C)

    smat = jnp.asarray(_build_shift_matrices(H, W))           # (9, N, N)

    # NCHW -> (B, N, C) tokens-by-channels (channels on the lane axis).
    x_nc = jnp.transpose(x_nchw, (0, 2, 3, 1)).reshape(B, N, C)

    kernel = functools.partial(attention_kernel, num_heads=num_heads,
                               key_dim=key_dim, head_dim=head_dim)

    def full(shape):
        return pl.BlockSpec(shape, lambda b, _s=len(shape): (0,) * _s)

    out_nc = pl.pallas_call(
        kernel,
        out_shape=jax.ShapeDtypeStruct((B, N, C), x_nc.dtype),
        grid=(B,),
        in_specs=[
            pl.BlockSpec((1, N, C), lambda b: (b, 0, 0)),     # x, one batch element per step
            full((C, nh_kd)), full((C, nh_kd)), full((C, C)),  # Wq^T, Wk^T, Wv^T (BN-fused)
            full((1, nh_kd)), full((1, nh_kd)), full((1, C)),  # bq, bk, bv
            full((9, N, N)),                                   # spatial-shift matrices
            full((9, C)), full((1, C)),                        # pe tap weights, pe bias
            full((C, C)), full((1, C)),                        # Wp^T, bp
        ],
        out_specs=pl.BlockSpec((1, N, C), lambda b: (b, 0, 0)),
        compiler_params=pltpu.CompilerParams(dimension_semantics=("parallel",)),
    )(x_nc, wq_t, wk_t, wv_t, bq, bk, bv, smat, pe_w9, pe_b, wp_t, bp)

    return jnp.transpose(out_nc.reshape(B, H, W, C), (0, 3, 1, 2))


# --------------------------------------------------------------------------
# Pure-JAX reference reproducing the PyTorch forward pass (eval-mode BN).
# --------------------------------------------------------------------------
def attention_reference(x, params, num_heads, attn_ratio=0.5):
    qkv_w, qkv_bn, pe_w, pe_bn, proj_w, proj_bn = params
    B, C, H, W = x.shape
    N = H * W
    head_dim = C // num_heads
    key_dim = int(head_dim * attn_ratio)
    scale = key_dim ** -0.5

    def bn(y, p, eps=1e-5):
        gamma, beta, mean, var = p
        inv = gamma / jnp.sqrt(var + eps)
        return (y - mean[None, :, None, None]) * inv[None, :, None, None] + beta[None, :, None, None]

    qkv = bn(jnp.einsum('bchw,oc->bohw', x, qkv_w), qkv_bn)               # (B, h, H, W)
    qkv = qkv.reshape(B, num_heads, 2 * key_dim + head_dim, N)
    q = qkv[:, :, :key_dim]
    k = qkv[:, :, key_dim:2 * key_dim]
    v = qkv[:, :, 2 * key_dim:]

    attn = jnp.einsum('bhdn,bhdm->bhnm', q, k) * scale
    attn = jax.nn.softmax(attn, axis=-1)
    xo = jnp.einsum('bhdn,bhmn->bhdm', v, attn).reshape(B, C, H, W)

    pe = lax.conv_general_dilated(
        v.reshape(B, C, H, W), pe_w, window_strides=(1, 1),
        padding=((1, 1), (1, 1)), feature_group_count=C,
        dimension_numbers=('NCHW', 'OIHW', 'NCHW'))
    pe = bn(pe, pe_bn)

    y = xo + pe
    return bn(jnp.einsum('bchw,oc->bohw', y, proj_w), proj_bn)


# --------------------------------------------------------------------------
# Deterministic parameter construction.
# --------------------------------------------------------------------------
def _bn_params(key, n):
    k1, k2, k3, k4 = jax.random.split(key, 4)
    gamma = 1.0 + 0.1 * jax.random.normal(k1, (n,), jnp.float32)
    beta = 0.1 * jax.random.normal(k2, (n,), jnp.float32)
    mean = 0.1 * jax.random.normal(k3, (n,), jnp.float32)
    var = 1.0 + 0.1 * jnp.abs(jax.random.normal(k4, (n,), jnp.float32))
    return (gamma, beta, mean, var)


def make_params(key, C, num_heads, attn_ratio=0.5):
    head_dim = C // num_heads
    key_dim = int(head_dim * attn_ratio)
    h = C + 2 * key_dim * num_heads
    ks = jax.random.split(key, 6)
    s = 0.1
    qkv_w = s * jax.random.normal(ks[0], (h, C), jnp.float32)          # 1x1 conv, no bias
    qkv_bn = _bn_params(ks[1], h)
    pe_w = s * jax.random.normal(ks[2], (C, 1, 3, 3), jnp.float32)     # depthwise 3x3, groups=C
    pe_bn = _bn_params(ks[3], C)
    proj_w = s * jax.random.normal(ks[4], (C, C), jnp.float32)         # 1x1 conv, no bias
    proj_bn = _bn_params(ks[5], C)
    return (qkv_w, qkv_bn, pe_w, pe_bn, proj_w, proj_bn)


if __name__ == "__main__":
    B, C, H, W = 2, 32, 8, 8
    num_heads = 2
    attn_ratio = 0.5

    key = jax.random.PRNGKey(0)
    kx, kp = jax.random.split(key)
    x = jax.random.normal(kx, (B, C, H, W), jnp.float32)
    params = make_params(kp, C, num_heads, attn_ratio)

    out = attention_pallas(x, params, num_heads, attn_ratio)
    out = jax.block_until_ready(out)

    ref = attention_reference(x, params, num_heads, attn_ratio)
    assert out.shape == ref.shape == (B, C, H, W)
    assert jnp.allclose(out, ref, atol=1e-4, rtol=1e-4), "mismatch vs pure-JAX reference"
    print("KERNEL_OK")
</pallas_src>

<mosaic_0001>
module attributes {stable_mosaic.version = 11 : i64} {
  func.func @attention_kernel(%arg0: i32, %arg1: memref<1x64x32xf32, #tpu.memory_space<vmem>>, %arg2: memref<32x16xf32, #tpu.memory_space<vmem>>, %arg3: memref<32x16xf32, #tpu.memory_space<vmem>>, %arg4: memref<32x32xf32, #tpu.memory_space<vmem>>, %arg5: memref<1x16xf32, #tpu.memory_space<vmem>>, %arg6: memref<1x16xf32, #tpu.memory_space<vmem>>, %arg7: memref<1x32xf32, #tpu.memory_space<vmem>>, %arg8: memref<9x64x64xf32, #tpu.memory_space<vmem>>, %arg9: memref<9x32xf32, #tpu.memory_space<vmem>>, %arg10: memref<1x32xf32, #tpu.memory_space<vmem>>, %arg11: memref<32x32xf32, #tpu.memory_space<vmem>>, %arg12: memref<1x32xf32, #tpu.memory_space<vmem>>, %arg13: memref<1x64x32xf32, #tpu.memory_space<vmem>>) attributes {dimension_semantics = [#tpu.dimension_semantics<parallel>], iteration_bounds = array<i64: 2>, scalar_prefetch = 0 : i64, scratch_operands = 0 : i64, tpu.core_type = #tpu.core_type<tc>, window_params = [{transform_indices = @transform_0, window_bounds = array<i64: 1, 64, 32>}, {pipeline_mode = #tpu.pipeline_mode<synchronous>, transform_indices = @transform_1, window_bounds = array<i64: 32, 16>}, {pipeline_mode = #tpu.pipeline_mode<synchronous>, transform_indices = @transform_2, window_bounds = array<i64: 32, 16>}, {pipeline_mode = #tpu.pipeline_mode<synchronous>, transform_indices = @transform_3, window_bounds = array<i64: 32, 32>}, {pipeline_mode = #tpu.pipeline_mode<synchronous>, transform_indices = @transform_4, window_bounds = array<i64: 1, 16>}, {pipeline_mode = #tpu.pipeline_mode<synchronous>, transform_indices = @transform_5, window_bounds = array<i64: 1, 16>}, {pipeline_mode = #tpu.pipeline_mode<synchronous>, transform_indices = @transform_6, window_bounds = array<i64: 1, 32>}, {pipeline_mode = #tpu.pipeline_mode<synchronous>, transform_indices = @transform_7, window_bounds = array<i64: 9, 64, 64>}, {pipeline_mode = #tpu.pipeline_mode<synchronous>, transform_indices = @transform_8, window_bounds = array<i64: 9, 32>}, {pipeline_mode = #tpu.pipeline_mode<synchronous>, transform_indices = @transform_9, window_bounds = array<i64: 1, 32>}, {pipeline_mode = #tpu.pipeline_mode<synchronous>, transform_indices = @transform_10, window_bounds = array<i64: 32, 32>}, {pipeline_mode = #tpu.pipeline_mode<synchronous>, transform_indices = @transform_11, window_bounds = array<i64: 1, 32>}, {transform_indices = @transform_12, window_bounds = array<i64: 1, 64, 32>}]} {
    %c0 = arith.constant 0 : index
    %c0_0 = arith.constant 0 : index
    %c0_1 = arith.constant 0 : index
    %0 = vector.load %arg1[%c0, %c0_0, %c0_1] : memref<1x64x32xf32, #tpu.memory_space<vmem>>, vector<1x64x32xf32>
    %1 = vector.shape_cast %0 : vector<1x64x32xf32> to vector<64x32xf32>
    %c0_2 = arith.constant 0 : index
    %c0_3 = arith.constant 0 : index
    %2 = vector.load %arg2[%c0_2, %c0_3] : memref<32x16xf32, #tpu.memory_space<vmem>>, vector<32x16xf32>
    %cst = arith.constant dense<0.000000e+00> : vector<64x16xf32>
    %3 = tpu.matmul %1, %2, %cst {dimension_numbers = #tpu.dot_dimension_numbers<[1], [0], [0], [1], [0, 0, 1, 1], [], []>} : vector<64x32xf32>, vector<32x16xf32>, vector<64x16xf32> -> vector<64x16xf32>
    %c0_4 = arith.constant 0 : index
    %c0_5 = arith.constant 0 : index
    %4 = vector.load %arg5[%c0_4, %c0_5] : memref<1x16xf32, #tpu.memory_space<vmem>>, vector<1x16xf32>
    %5 = vector.broadcast %4 : vector<1x16xf32> to vector<64x16xf32>
    %6 = arith.addf %3, %5 : vector<64x16xf32>
    %c0_6 = arith.constant 0 : index
    %c0_7 = arith.constant 0 : index
    %7 = vector.load %arg3[%c0_6, %c0_7] : memref<32x16xf32, #tpu.memory_space<vmem>>, vector<32x16xf32>
    %cst_8 = arith.constant dense<0.000000e+00> : vector<64x16xf32>
    %8 = tpu.matmul %1, %7, %cst_8 {dimension_numbers = #tpu.dot_dimension_numbers<[1], [0], [0], [1], [0, 0, 1, 1], [], []>} : vector<64x32xf32>, vector<32x16xf32>, vector<64x16xf32> -> vector<64x16xf32>
    %c0_9 = arith.constant 0 : index
    %c0_10 = arith.constant 0 : index
    %9 = vector.load %arg6[%c0_9, %c0_10] : memref<1x16xf32, #tpu.memory_space<vmem>>, vector<1x16xf32>
    %10 = vector.broadcast %9 : vector<1x16xf32> to vector<64x16xf32>
    %11 = arith.addf %8, %10 : vector<64x16xf32>
    %c0_11 = arith.constant 0 : index
    %c0_12 = arith.constant 0 : index
    %12 = vector.load %arg4[%c0_11, %c0_12] : memref<32x32xf32, #tpu.memory_space<vmem>>, vector<32x32xf32>
    %cst_13 = arith.constant dense<0.000000e+00> : vector<64x32xf32>
    %13 = tpu.matmul %1, %12, %cst_13 {dimension_numbers = #tpu.dot_dimension_numbers<[1], [0], [0], [1], [0, 0, 1, 1], [], []>} : vector<64x32xf32>, vector<32x32xf32>, vector<64x32xf32> -> vector<64x32xf32>
    %c0_14 = arith.constant 0 : index
    %c0_15 = arith.constant 0 : index
    %14 = vector.load %arg7[%c0_14, %c0_15] : memref<1x32xf32, #tpu.memory_space<vmem>>, vector<1x32xf32>
    %15 = vector.broadcast %14 : vector<1x32xf32> to vector<64x32xf32>
    %16 = arith.addf %13, %15 : vector<64x32xf32>
    %c0_16 = arith.constant 0 : index
    %c0_17 = arith.constant 0 : index
    %17 = vector.load %arg9[%c0_16, %c0_17] : memref<9x32xf32, #tpu.memory_space<vmem>>, vector<9x32xf32>
    %cst_18 = arith.constant 0.000000e+00 : f32
    %18 = vector.broadcast %cst_18 : f32 to vector<64x32xf32>
    %c0_19 = arith.constant 0 : index
    %c0_20 = arith.constant 0 : index
    %19 = vector.load %arg10[%c0_19, %c0_20] : memref<1x32xf32, #tpu.memory_space<vmem>>, vector<1x32xf32>
    %20 = vector.broadcast %19 : vector<1x32xf32> to vector<64x32xf32>
    %21 = arith.addf %18, %20 : vector<64x32xf32>
    %c0_21 = arith.constant 0 : index
    %c0_22 = arith.constant 0 : index
    %c0_23 = arith.constant 0 : index
    %22 = vector.load %arg8[%c0_21, %c0_22, %c0_23] : memref<9x64x64xf32, #tpu.memory_space<vmem>>, vector<1x64x64xf32>
    %23 = vector.shape_cast %22 : vector<1x64x64xf32> to vector<64x64xf32>
    %cst_24 = arith.constant dense<0.000000e+00> : vector<64x32xf32>
    %24 = tpu.matmul %23, %16, %cst_24 {dimension_numbers = #tpu.dot_dimension_numbers<[1], [0], [0], [1], [0, 0, 1, 1], [], []>} : vector<64x64xf32>, vector<64x32xf32>, vector<64x32xf32> -> vector<64x32xf32>
    %25 = vector.extract_strided_slice %17 {offsets = [0, 0], sizes = [1, 32], strides = [1, 1]} : vector<9x32xf32> to vector<1x32xf32>
    %26 = vector.broadcast %25 : vector<1x32xf32> to vector<64x32xf32>
    %27 = arith.mulf %24, %26 : vector<64x32xf32>
    %28 = arith.addf %21, %27 : vector<64x32xf32>
    %c1 = arith.constant 1 : index
    %c0_25 = arith.constant 0 : index
    %c0_26 = arith.constant 0 : index
    %29 = vector.load %arg8[%c1, %c0_25, %c0_26] : memref<9x64x64xf32, #tpu.memory_space<vmem>>, vector<1x64x64xf32>
    %30 = vector.shape_cast %29 : vector<1x64x64xf32> to vector<64x64xf32>
    %cst_27 = arith.constant dense<0.000000e+00> : vector<64x32xf32>
    %31 = tpu.matmul %30, %16, %cst_27 {dimension_numbers = #tpu.dot_dimension_numbers<[1], [0], [0], [1], [0, 0, 1, 1], [], []>} : vector<64x64xf32>, vector<64x32xf32>, vector<64x32xf32> -> vector<64x32xf32>
    %32 = vector.extract_strided_slice %17 {offsets = [1, 0], sizes = [1, 32], strides = [1, 1]} : vector<9x32xf32> to vector<1x32xf32>
    %33 = vector.broadcast %32 : vector<1x32xf32> to vector<64x32xf32>
    %34 = arith.mulf %31, %33 : vector<64x32xf32>
    %35 = arith.addf %28, %34 : vector<64x32xf32>
    %c2 = arith.constant 2 : index
    %c0_28 = arith.constant 0 : index
    %c0_29 = arith.constant 0 : index
    %36 = vector.load %arg8[%c2, %c0_28, %c0_29] : memref<9x64x64xf32, #tpu.memory_space<vmem>>, vector<1x64x64xf32>
    %37 = vector.shape_cast %36 : vector<1x64x64xf32> to vector<64x64xf32>
    %cst_30 = arith.constant dense<0.000000e+00> : vector<64x32xf32>
    %38 = tpu.matmul %37, %16, %cst_30 {dimension_numbers = #tpu.dot_dimension_numbers<[1], [0], [0], [1], [0, 0, 1, 1], [], []>} : vector<64x64xf32>, vector<64x32xf32>, vector<64x32xf32> -> vector<64x32xf32>
    %39 = vector.extract_strided_slice %17 {offsets = [2, 0], sizes = [1, 32], strides = [1, 1]} : vector<9x32xf32> to vector<1x32xf32>
    %40 = vector.broadcast %39 : vector<1x32xf32> to vector<64x32xf32>
    %41 = arith.mulf %38, %40 : vector<64x32xf32>
    %42 = arith.addf %35, %41 : vector<64x32xf32>
    %c3 = arith.constant 3 : index
    %c0_31 = arith.constant 0 : index
    %c0_32 = arith.constant 0 : index
    %43 = vector.load %arg8[%c3, %c0_31, %c0_32] : memref<9x64x64xf32, #tpu.memory_space<vmem>>, vector<1x64x64xf32>
    %44 = vector.shape_cast %43 : vector<1x64x64xf32> to vector<64x64xf32>
    %cst_33 = arith.constant dense<0.000000e+00> : vector<64x32xf32>
    %45 = tpu.matmul %44, %16, %cst_33 {dimension_numbers = #tpu.dot_dimension_numbers<[1], [0], [0], [1], [0, 0, 1, 1], [], []>} : vector<64x64xf32>, vector<64x32xf32>, vector<64x32xf32> -> vector<64x32xf32>
    %46 = vector.extract_strided_slice %17 {offsets = [3, 0], sizes = [1, 32], strides = [1, 1]} : vector<9x32xf32> to vector<1x32xf32>
    %47 = vector.broadcast %46 : vector<1x32xf32> to vector<64x32xf32>
    %48 = arith.mulf %45, %47 : vector<64x32xf32>
    %49 = arith.addf %42, %48 : vector<64x32xf32>
    %c4 = arith.constant 4 : index
    %c0_34 = arith.constant 0 : index
    %c0_35 = arith.constant 0 : index
    %50 = vector.load %arg8[%c4, %c0_34, %c0_35] : memref<9x64x64xf32, #tpu.memory_space<vmem>>, vector<1x64x64xf32>
    %51 = vector.shape_cast %50 : vector<1x64x64xf32> to vector<64x64xf32>
    %cst_36 = arith.constant dense<0.000000e+00> : vector<64x32xf32>
    %52 = tpu.matmul %51, %16, %cst_36 {dimension_numbers = #tpu.dot_dimension_numbers<[1], [0], [0], [1], [0, 0, 1, 1], [], []>} : vector<64x64xf32>, vector<64x32xf32>, vector<64x32xf32> -> vector<64x32xf32>
    %53 = vector.extract_strided_slice %17 {offsets = [4, 0], sizes = [1, 32], strides = [1, 1]} : vector<9x32xf32> to vector<1x32xf32>
    %54 = vector.broadcast %53 : vector<1x32xf32> to vector<64x32xf32>
    %55 = arith.mulf %52, %54 : vector<64x32xf32>
    %56 = arith.addf %49, %55 : vector<64x32xf32>
    %c5 = arith.constant 5 : index
    %c0_37 = arith.constant 0 : index
    %c0_38 = arith.constant 0 : index
    %57 = vector.load %arg8[%c5, %c0_37, %c0_38] : memref<9x64x64xf32, #tpu.memory_space<vmem>>, vector<1x64x64xf32>
    %58 = vector.shape_cast %57 : vector<1x64x64xf32> to vector<64x64xf32>
    %cst_39 = arith.constant dense<0.000000e+00> : vector<64x32xf32>
    %59 = tpu.matmul %58, %16, %cst_39 {dimension_numbers = #tpu.dot_dimension_numbers<[1], [0], [0], [1], [0, 0, 1, 1], [], []>} : vector<64x64xf32>, vector<64x32xf32>, vector<64x32xf32> -> vector<64x32xf32>
    %60 = vector.extract_strided_slice %17 {offsets = [5, 0], sizes = [1, 32], strides = [1, 1]} : vector<9x32xf32> to vector<1x32xf32>
    %61 = vector.broadcast %60 : vector<1x32xf32> to vector<64x32xf32>
    %62 = arith.mulf %59, %61 : vector<64x32xf32>
    %63 = arith.addf %56, %62 : vector<64x32xf32>
    %c6 = arith.constant 6 : index
    %c0_40 = arith.constant 0 : index
    %c0_41 = arith.constant 0 : index
    %64 = vector.load %arg8[%c6, %c0_40, %c0_41] : memref<9x64x64xf32, #tpu.memory_space<vmem>>, vector<1x64x64xf32>
    %65 = vector.shape_cast %64 : vector<1x64x64xf32> to vector<64x64xf32>
    %cst_42 = arith.constant dense<0.000000e+00> : vector<64x32xf32>
    %66 = tpu.matmul %65, %16, %cst_42 {dimension_numbers = #tpu.dot_dimension_numbers<[1], [0], [0], [1], [0, 0, 1, 1], [], []>} : vector<64x64xf32>, vector<64x32xf32>, vector<64x32xf32> -> vector<64x32xf32>
    %67 = vector.extract_strided_slice %17 {offsets = [6, 0], sizes = [1, 32], strides = [1, 1]} : vector<9x32xf32> to vector<1x32xf32>
    %68 = vector.broadcast %67 : vector<1x32xf32> to vector<64x32xf32>
    %69 = arith.mulf %66, %68 : vector<64x32xf32>
    %70 = arith.addf %63, %69 : vector<64x32xf32>
    %c7 = arith.constant 7 : index
    %c0_43 = arith.constant 0 : index
    %c0_44 = arith.constant 0 : index
    %71 = vector.load %arg8[%c7, %c0_43, %c0_44] : memref<9x64x64xf32, #tpu.memory_space<vmem>>, vector<1x64x64xf32>
    %72 = vector.shape_cast %71 : vector<1x64x64xf32> to vector<64x64xf32>
    %cst_45 = arith.constant dense<0.000000e+00> : vector<64x32xf32>
    %73 = tpu.matmul %72, %16, %cst_45 {dimension_numbers = #tpu.dot_dimension_numbers<[1], [0], [0], [1], [0, 0, 1, 1], [], []>} : vector<64x64xf32>, vector<64x32xf32>, vector<64x32xf32> -> vector<64x32xf32>
    %74 = vector.extract_strided_slice %17 {offsets = [7, 0], sizes = [1, 32], strides = [1, 1]} : vector<9x32xf32> to vector<1x32xf32>
    %75 = vector.broadcast %74 : vector<1x32xf32> to vector<64x32xf32>
    %76 = arith.mulf %73, %75 : vector<64x32xf32>
    %77 = arith.addf %70, %76 : vector<64x32xf32>
    %c8 = arith.constant 8 : index
    %c0_46 = arith.constant 0 : index
    %c0_47 = arith.constant 0 : index
    %78 = vector.load %arg8[%c8, %c0_46, %c0_47] : memref<9x64x64xf32, #tpu.memory_space<vmem>>, vector<1x64x64xf32>
    %79 = vector.shape_cast %78 : vector<1x64x64xf32> to vector<64x64xf32>
    %cst_48 = arith.constant dense<0.000000e+00> : vector<64x32xf32>
    %80 = tpu.matmul %79, %16, %cst_48 {dimension_numbers = #tpu.dot_dimension_numbers<[1], [0], [0], [1], [0, 0, 1, 1], [], []>} : vector<64x64xf32>, vector<64x32xf32>, vector<64x32xf32> -> vector<64x32xf32>
    %81 = vector.extract_strided_slice %17 {offsets = [8, 0], sizes = [1, 32], strides = [1, 1]} : vector<9x32xf32> to vector<1x32xf32>
    %82 = vector.broadcast %81 : vector<1x32xf32> to vector<64x32xf32>
    %83 = arith.mulf %80, %82 : vector<64x32xf32>
    %84 = arith.addf %77, %83 : vector<64x32xf32>
    %c0_49 = arith.constant 0 : index
    %c0_50 = arith.constant 0 : index
    %85 = vector.load %arg11[%c0_49, %c0_50] : memref<32x32xf32, #tpu.memory_space<vmem>>, vector<32x32xf32>
    %cst_51 = arith.constant dense<0.000000e+00> : vector<64x32xf32>
    %86 = tpu.matmul %84, %85, %cst_51 {dimension_numbers = #tpu.dot_dimension_numbers<[1], [0], [0], [1], [0, 0, 1, 1], [], []>} : vector<64x32xf32>, vector<32x32xf32>, vector<64x32xf32> -> vector<64x32xf32>
    %c0_52 = arith.constant 0 : index
    %c0_53 = arith.constant 0 : index
    %87 = vector.load %arg12[%c0_52, %c0_53] : memref<1x32xf32, #tpu.memory_space<vmem>>, vector<1x32xf32>
    %88 = vector.broadcast %87 : vector<1x32xf32> to vector<64x32xf32>
    %89 = arith.addf %86, %88 : vector<64x32xf32>
    %90 = vector.extract_strided_slice %6 {offsets = [0, 0], sizes = [64, 8], strides = [1, 1]} : vector<64x16xf32> to vector<64x8xf32>
    %91 = vector.extract_strided_slice %11 {offsets = [0, 0], sizes = [64, 8], strides = [1, 1]} : vector<64x16xf32> to vector<64x8xf32>
    %92 = vector.extract_strided_slice %16 {offsets = [0, 0], sizes = [64, 16], strides = [1, 1]} : vector<64x32xf32> to vector<64x16xf32>
    %cst_54 = arith.constant dense<0.000000e+00> : vector<64x64xf32>
    %93 = tpu.matmul %90, %91, %cst_54 {dimension_numbers = #tpu.dot_dimension_numbers<[1], [1], [0], [0], [0, 0, 1, 0], [], []>} : vector<64x8xf32>, vector<64x8xf32>, vector<64x64xf32> -> vector<64x64xf32>
    %cst_55 = arith.constant 0.353553385 : f32
    %94 = vector.broadcast %cst_55 : f32 to vector<64x64xf32>
    %95 = arith.mulf %93, %94 : vector<64x64xf32>
    %cst_56 = arith.constant dense<0xFF800000> : vector<64xf32>
    %96 = vector.multi_reduction <maximumf>, %95, %cst_56 [1] : vector<64x64xf32> to vector<64xf32>
    %97 = vector.shape_cast %96 : vector<64xf32> to vector<64x1xf32>
    %98 = vector.broadcast %97 : vector<64x1xf32> to vector<64x64xf32>
    %99 = arith.subf %95, %98 : vector<64x64xf32>
    %100 = math.exp %99 : vector<64x64xf32>
    %cst_57 = arith.constant dense<0.000000e+00> : vector<64xf32>
    %101 = vector.multi_reduction <add>, %100, %cst_57 [1] : vector<64x64xf32> to vector<64xf32>
    %102 = vector.shape_cast %101 : vector<64xf32> to vector<64x1xf32>
    %103 = tpu.reciprocal %102 : vector<64x1xf32> -> vector<64x1xf32>
    %104 = vector.broadcast %103 : vector<64x1xf32> to vector<64x64xf32>
    %105 = arith.mulf %100, %104 : vector<64x64xf32>
    %cst_58 = arith.constant dense<0.000000e+00> : vector<64x16xf32>
    %106 = tpu.matmul %105, %92, %cst_58 {dimension_numbers = #tpu.dot_dimension_numbers<[1], [0], [0], [1], [0, 0, 1, 1], [], []>} : vector<64x64xf32>, vector<64x16xf32>, vector<64x16xf32> -> vector<64x16xf32>
    %107 = vector.extract_strided_slice %85 {offsets = [0, 0], sizes = [16, 32], strides = [1, 1]} : vector<32x32xf32> to vector<16x32xf32>
    %cst_59 = arith.constant dense<0.000000e+00> : vector<64x32xf32>
    %108 = tpu.matmul %106, %107, %cst_59 {dimension_numbers = #tpu.dot_dimension_numbers<[1], [0], [0], [1], [0, 0, 1, 1], [], []>} : vector<64x16xf32>, vector<16x32xf32>, vector<64x32xf32> -> vector<64x32xf32>
    %109 = arith.addf %89, %108 : vector<64x32xf32>
    %110 = vector.extract_strided_slice %6 {offsets = [0, 8], sizes = [64, 8], strides = [1, 1]} : vector<64x16xf32> to vector<64x8xf32>
    %111 = vector.extract_strided_slice %11 {offsets = [0, 8], sizes = [64, 8], strides = [1, 1]} : vector<64x16xf32> to vector<64x8xf32>
    %112 = vector.extract_strided_slice %16 {offsets = [0, 16], sizes = [64, 16], strides = [1, 1]} : vector<64x32xf32> to vector<64x16xf32>
    %cst_60 = arith.constant dense<0.000000e+00> : vector<64x64xf32>
    %113 = tpu.matmul %110, %111, %cst_60 {dimension_numbers = #tpu.dot_dimension_numbers<[1], [1], [0], [0], [0, 0, 1, 0], [], []>} : vector<64x8xf32>, vector<64x8xf32>, vector<64x64xf32> -> vector<64x64xf32>
    %cst_61 = arith.constant 0.353553385 : f32
    %114 = vector.broadcast %cst_61 : f32 to vector<64x64xf32>
    %115 = arith.mulf %113, %114 : vector<64x64xf32>
    %cst_62 = arith.constant dense<0xFF800000> : vector<64xf32>
    %116 = vector.multi_reduction <maximumf>, %115, %cst_62 [1] : vector<64x64xf32> to vector<64xf32>
    %117 = vector.shape_cast %116 : vector<64xf32> to vector<64x1xf32>
    %118 = vector.broadcast %117 : vector<64x1xf32> to vector<64x64xf32>
    %119 = arith.subf %115, %118 : vector<64x64xf32>
    %120 = math.exp %119 : vector<64x64xf32>
    %cst_63 = arith.constant dense<0.000000e+00> : vector<64xf32>
    %121 = vector.multi_reduction <add>, %120, %cst_63 [1] : vector<64x64xf32> to vector<64xf32>
    %122 = vector.shape_cast %121 : vector<64xf32> to vector<64x1xf32>
    %123 = tpu.reciprocal %122 : vector<64x1xf32> -> vector<64x1xf32>
    %124 = vector.broadcast %123 : vector<64x1xf32> to vector<64x64xf32>
    %125 = arith.mulf %120, %124 : vector<64x64xf32>
    %cst_64 = arith.constant dense<0.000000e+00> : vector<64x16xf32>
    %126 = tpu.matmul %125, %112, %cst_64 {dimension_numbers = #tpu.dot_dimension_numbers<[1], [0], [0], [1], [0, 0, 1, 1], [], []>} : vector<64x64xf32>, vector<64x16xf32>, vector<64x16xf32> -> vector<64x16xf32>
    %127 = vector.extract_strided_slice %85 {offsets = [16, 0], sizes = [16, 32], strides = [1, 1]} : vector<32x32xf32> to vector<16x32xf32>
    %cst_65 = arith.constant dense<0.000000e+00> : vector<64x32xf32>
    %128 = tpu.matmul %126, %127, %cst_65 {dimension_numbers = #tpu.dot_dimension_numbers<[1], [0], [0], [1], [0, 0, 1, 1], [], []>} : vector<64x16xf32>, vector<16x32xf32>, vector<64x32xf32> -> vector<64x32xf32>
    %129 = arith.addf %109, %128 : vector<64x32xf32>
    %c0_66 = arith.constant 0 : index
    %c0_67 = arith.constant 0 : index
    %c0_68 = arith.constant 0 : index
    %130 = vector.load %arg13[%c0_66, %c0_67, %c0_68] : memref<1x64x32xf32, #tpu.memory_space<vmem>>, vector<1x64x32xf32>
    %131 = vector.shape_cast %130 : vector<1x64x32xf32> to vector<64x32xf32>
    %132 = vector.shape_cast %129 : vector<64x32xf32> to vector<1x64x32xf32>
    tpu.vector_store %arg13[%c0_66, %c0_67, %c0_68], %132 {strides = array<i32>} : memref<1x64x32xf32, #tpu.memory_space<vmem>>, vector<1x64x32xf32>,
    return
  }
  func.func @transform_0(%arg0: i32) -> (i32, i32, i32) {
    %c0_i32 = arith.constant 0 : i32
    %c0_i32_0 = arith.constant 0 : i32
    %c0_i32_1 = arith.constant 0 : i32
    return %arg0, %c0_i32, %c0_i32_0 : i32, i32, i32
  }
  func.func @transform_1(%arg0: i32) -> (i32, i32) {
    %c0_i32 = arith.constant 0 : i32
    %c0_i32_0 = arith.constant 0 : i32
    %c0_i32_1 = arith.constant 0 : i32
    return %c0_i32, %c0_i32_0 : i32, i32
  }
  func.func @transform_2(%arg0: i32) -> (i32, i32) {
    %c0_i32 = arith.constant 0 : i32
    %c0_i32_0 = arith.constant 0 : i32
    %c0_i32_1 = arith.constant 0 : i32
    return %c0_i32, %c0_i32_0 : i32, i32
  }
  func.func @transform_3(%arg0: i32) -> (i32, i32) {
    %c0_i32 = arith.constant 0 : i32
    %c0_i32_0 = arith.constant 0 : i32
    %c0_i32_1 = arith.constant 0 : i32
    return %c0_i32, %c0_i32_0 : i32, i32
  }
  func.func @transform_4(%arg0: i32) -> (i32, i32) {
    %c0_i32 = arith.constant 0 : i32
    %c0_i32_0 = arith.constant 0 : i32
    %c0_i32_1 = arith.constant 0 : i32
    return %c0_i32, %c0_i32_0 : i32, i32
  }
  func.func @transform_5(%arg0: i32) -> (i32, i32) {
    %c0_i32 = arith.constant 0 : i32
    %c0_i32_0 = arith.constant 0 : i32
    %c0_i32_1 = arith.constant 0 : i32
    return %c0_i32, %c0_i32_0 : i32, i32
  }
  func.func @transform_6(%arg0: i32) -> (i32, i32) {
    %c0_i32 = arith.constant 0 : i32
    %c0_i32_0 = arith.constant 0 : i32
    %c0_i32_1 = arith.constant 0 : i32
    return %c0_i32, %c0_i32_0 : i32, i32
  }
  func.func @transform_7(%arg0: i32) -> (i32, i32, i32) {
    %c0_i32 = arith.constant 0 : i32
    %c0_i32_0 = arith.constant 0 : i32
    %c0_i32_1 = arith.constant 0 : i32
    %c0_i32_2 = arith.constant 0 : i32
    return %c0_i32, %c0_i32_0, %c0_i32_1 : i32, i32, i32
  }
  func.func @transform_8(%arg0: i32) -> (i32, i32) {
    %c0_i32 = arith.constant 0 : i32
    %c0_i32_0 = arith.constant 0 : i32
    %c0_i32_1 = arith.constant 0 : i32
    return %c0_i32, %c0_i32_0 : i32, i32
  }
  func.func @transform_9(%arg0: i32) -> (i32, i32) {
    %c0_i32 = arith.constant 0 : i32
    %c0_i32_0 = arith.constant 0 : i32
    %c0_i32_1 = arith.constant 0 : i32
    return %c0_i32, %c0_i32_0 : i32, i32
  }
  func.func @transform_10(%arg0: i32) -> (i32, i32) {
    %c0_i32 = arith.constant 0 : i32
    %c0_i32_0 = arith.constant 0 : i32
    %c0_i32_1 = arith.constant 0 : i32
    return %c0_i32, %c0_i32_0 : i32, i32
  }
  func.func @transform_11(%arg0: i32) -> (i32, i32) {
    %c0_i32 = arith.constant 0 : i32
    %c0_i32_0 = arith.constant 0 : i32
    %c0_i32_1 = arith.constant 0 : i32
    return %c0_i32, %c0_i32_0 : i32, i32
  }
  func.func @transform_12(%arg0: i32) -> (i32, i32, i32) {
    %c0_i32 = arith.constant 0 : i32
    %c0_i32_0 = arith.constant 0 : i32
    %c0_i32_1 = arith.constant 0 : i32
    return %arg0, %c0_i32, %c0_i32_0 : i32, i32, i32
  }
}

</mosaic_0001>

<bundles_post_ra>
// kernel: tpu_custom_call.1
= control target key start
LH: loop header
LB: loop body
LE: loop exit
PB: predicated region body
PF: predicated region fallthrough
CT: control target
= control target key end

     0   :  { %17 = vsyncpa [#allocation3], 0  ;;  %s5007_s21 = smov 0   ;;  %s5736_s0 = inlined_call_operand.vmem [shape: f32[2,64,32], index: 0, kind: input, shape index: {}]   ;;  %s5737_s1 = inlined_call_operand.vmem [shape: f32[32,16], index: 1, kind: input, shape index: {}]   ;;  %s5738_s2 = inlined_call_operand.vmem [shape: f32[32,16], index: 2, kind: input, shape index: {}]   ;;  %s5739_s3 = inlined_call_operand.vmem [shape: f32[32,32], index: 3, kind: input, shape index: {}]   ;;  %s5740_s4 = inlined_call_operand.vmem [shape: f32[1,16], index: 4, kind: input, shape index: {}]   ;;  %s5741_s5 = inlined_call_operand.vmem [shape: f32[1,16], index: 5, kind: input, shape index: {}]   ;;  %s5742_s6 = inlined_call_operand.vmem [shape: f32[1,32], index: 6, kind: input, shape index: {}]   ;;  %s5743_s7 = inlined_call_operand.hbm [shape: f32[9,64,64], index: 7, kind: input, shape index: {}]   ;;  %s5744_s8 = inlined_call_operand.vmem [shape: f32[9,32], index: 8, kind: input, shape index: {}]   ;;  %s5745_s9 = inlined_call_operand.vmem [shape: f32[1,32], index: 9, kind: input, shape index: {}]   ;;  %s5746_s10 = inlined_call_operand.vmem [shape: f32[32,32], index: 10, kind: input, shape index: {}]   ;;  %s5747_s11 = inlined_call_operand.vmem [shape: f32[1,32], index: 11, kind: input, shape index: {}]   ;;  %s5748_s12 = inlined_call_operand.vmem [shape: f32[2,64,32], index: 12, kind: output, shape index: {}]  }
   0x1 LB: > { %s5013_s22 = sadd.s32 4294967295, %s4935_s21   ;;  %p3539_p0 = scmp.ge.s32.totalorder %s4935_s21, 1  ;;  %s4935_s21 = sphi %s5007_s21, %s23_s21  }
   0x2   : > { %p311_p1 = scmp.lt.s32.totalorder %s4935_s21, 3  ;;  %s4937_s23 = smov [#allocation2]  }
   0x3   : > { %s341_s24 = sshll.u32 %s4937_s23, 4  ;;  %p5749_p3 = scmp.eq.s32.totalorder %s5013_s22, 0  ;;  %s342_s24 = int_to_ptr.vmem [resolvable:$true] %s341_s24 }
   0x4   : > { %p5017_p2 = pnand %p3539_p0, %p311_p1  ;;  %s4897_s29 = scalar_lea.hbm %s5743_s7, 9216 }
   0x5   : > { %p4898_p6 = scmp.ne.s32.totalorder %s5743_s7, %s4897_s29  ;;  %p4904_p10 = scmp.lt.u32.totalorder %s4897_s29, %s5743_s7 }
   0x6   : > { %s5751_s25 = scalar_select %p5017_p2, 1, 0 }
   0x7   : > { %p4774_p4 = pneg %p5017_p2 }
   0x9   : > { %p5026_p5 = pnand %p5749_p3, %p4774_p4 }
   0xb   : > { %p4899_p7 = pneg %p5026_p5 }
   0xd   : > { %p4900_p8 = pnand %p4899_p7, %p4898_p6 }
   0xf   : > { %p4901_p9 = pneg %p4900_p8 }
  0x11   : > { %p4906_p11 = pnand %p4904_p10, %p4901_p9 }
  0x13   : > { %4909 = shalt.err (!%p4906_p11)
}
  0x14   : > { %s4910_s16 = scalar_lea.vmem %s342_s24, 9216  ;;  %p4918_p1 = scmp.lt.s32.totalorder %s342_s24, %s342_s24 }
  0x15   : > { %p4911_p12 = scmp.ne.s32.totalorder %s342_s24, %s4910_s16  ;;  %p4919_p4 = scmp.lt.s32.totalorder %s4910_s16, %s4910_s16 }
  0x17   : > { %p4913_p13 = pnand %p4911_p12, %p4899_p7  ;;  %p4920_p3 = por %p4919_p4, %p4918_p1 }
  0x19   : > { %p4914_p0 = pneg %p4913_p13 }
  0x1b   : > { %p4921_p2 = pnand %p4920_p3, %p4914_p0 }
  0x1d   : > { %4924 = shalt.err (!%p4921_p2)
}
  0x1e   : > { %s4938_s17 = smov 128   ;;  %s4939_s18 = smov 8  }
  0x1f   : > { %4777 = dma.hbm_to_vmem [thread:$0]  (!%p5026_p5), %s5743_s7, 9216, %s342_s24, [#allocation3], %s4938_s17, %s4938_s17, %s4939_s18  }
  0x20   : > { %p5753_p6 = scmp.ne.s32.totalorder %s5751_s25, 0 }
  0x21   : > { %p5754_p8 = scmp.eq.s32.totalorder (!%p5753_p6), %s5013_s22, 0 }
  0x22   : > { %377 = sbr.rel (%p5753_p6) target bundleno = 1601 (0x641), region = 68 }
  0x29   : > { %4930 = dma.done.wait (%p5754_p8), [#allocation3], 9216   ;;  %p5755_p7 = pmov %p5754_p8 }
  0x2a   : > { %p419_p2 = scmp.lt.s32.totalorder %s5013_s22, 1  ;;  %vm448_vm0 = vcmask 261120   ;;  %v437_v0 = vld [vmem:[%s5737_s1] sm:$0xff]  ;;  %v438_v1 = vld [vmem:[%s5737_s1 + $0x8] sm:$0xff]  ;;  %v439_v2 = vld [vmem:[%s5737_s1 + $0x10] sm:$0xff]  ;;  %vm828_vm1 = vcmask 523264  }
  0x2b   : > { %4932 = vsyncadd (%p5755_p7), [#allocation3], 4294958080  ;;  %v4478_v3 = vpack.c.bf16 %v438_v1, %v437_v0  ;;  %v440_v4 = vld [vmem:[%s5737_s1 + $0x18] sm:$0xff]  ;;  %v578_v8 = vld [vmem:[%s5738_s2] sm:$0xff]  ;;  %s4940_s28 = smov 120   ;;  %vm2382_vm2 = vcmask 64512  }
  0x2c   : > { %s5759_s22 = smov (!%p419_p2, %s5013_s22), 1  ;;  %v4482_v7 = vpack.c.bf16 %v440_v4, %v439_v2  ;;  %v579_v9 = vld [vmem:[%s5738_s2 + $0x8] sm:$0xff]  ;;  %v694_v10 = vld [vmem:[%s5739_s3] sm:$0xff]  ;;  %v580_v14 = vld [vmem:[%s5738_s2 + $0x10] sm:$0xff]  ;;  %vm2761_vm4 = vcmask 130048  }
  0x2d   : > { %s3724_s23 = sshll.u32 %s5759_s22, 6  ;;  %4479 = vmatprep.subr.bf16.mxu0 %v4478_v3  ;;  %4742 = vmatprep.subr.bf16.mxu1 %v4478_v3  ;;  %v695_v11 = vld [vmem:[%s5739_s3 + $0x8] sm:$0xff]  ;;  %v4486_v12 = vpack.c.bf16 %v579_v9, %v578_v8  ;;  %v581_v15 = vld [vmem:[%s5738_s2 + $0x18] sm:$0xff]  ;;  %v696_v16 = vld [vmem:[%s5739_s3 + $0x10] sm:$0xff] }
  0x2e   : > { %s5062_s25 = scalar_lea.vmem %s5736_s0, %s3724_s23  ;;  %4481 = vmatpush3.bf16.msra.mxu0 %v4478_v3  ;;  %4744 = vmatpush3.bf16.msra.mxu1 %v4478_v3  ;;  %v4494_v13 = vpack.c.bf16 %v695_v11, %v694_v10  ;;  %v697_v17 = vld [vmem:[%s5739_s3 + $0x18] sm:$0xff]  ;;  %v4490_v22 = vpack.c.bf16 %v581_v15, %v580_v14  ;;  %v820_v26 = vld [vmem:[#allocation2] sm:$0xff]  ;;  %vm5400_vm3 = vmpackc.low %vm2382_vm2, %vm2382_vm2  ;;  %s428_s15 = scalar_lea.vmem %s5748_s12, %s3724_s23 }
  0x2f   : > { %v429_v5 = vld [vmem:[%s5062_s25] sm:$0xff]  ;;  %4483 = vmatprep.subr.bf16.mxu0 %v4482_v7  ;;  %4743 = vmatprep.subr.bf16.mxu1 %v4482_v7  ;;  %v430_v18 = vld [vmem:[%s5062_s25 + $0x8] sm:$0xff]  ;;  %v431_v20 = vld [vmem:[%s5062_s25 + $0x10] sm:$0xff]  ;;  %v4498_v23 = vpack.c.bf16 %v697_v17, %v696_v16 }
  0x30   : > { %v433_v6 = vld [vmem:[%s5062_s25 + $0x20] sm:$0xff]  ;;  %4010 = vmatprep.mubr.msk.f32.mxu0 %vm448_vm0, %v429_v5  ;;  %v434_v19 = vld [vmem:[%s5062_s25 + $0x28] sm:$0xff]  ;;  %v435_v21 = vld [vmem:[%s5062_s25 + $0x30] sm:$0xff] }
  0x31   : > { %4016 = vmatprep.mubr.msk.f32.mxu1 %vm448_vm0, %v433_v6  ;;  %v432_v24 = vld [vmem:[%s5062_s25 + $0x18] sm:$0xff]  ;;  %v979_v27 = vld [vmem:[#allocation2 + $0x40] sm:$0xff] }
  0x32   : > { %4485 = vmatpush3.bf16.msra.mxu0 %v4482_v7  ;;  %4745 = vmatpush3.bf16.msra.mxu1 %v4482_v7  ;;  %v436_v25 = vld [vmem:[%s5062_s25 + $0x38] sm:$0xff]  ;;  %v5139_v29 = vld [vmem:[%s5740_s4] ss:$0 sm:$0xff] }
  0x33   : > { %4487 = vmatprep.subr.bf16.mxu1 %v4486_v12  ;;  %4495 = vmatprep.subr.bf16.mxu0 %v4494_v13  ;;  %v3557_v40 = vld [vmem:[%s5741_s5] ss:$0 sm:$0xff] }
  0x34   : > { %v3566_v41 = vld [vmem:[%s5742_s6] ss:$0 sm:$0xff] }
  0x35   : > { %4011 = vmatmul.mubr.msk.f32.vlgmr.msra.gmra.mrb[0].mxu0 %vm448_vm0, %v430_v18  ;;  %4017 = vmatmul.mubr.msk.f32.vlgmr.msra.gmra.mrb[0].mxu1 %vm448_vm0, %v434_v19 }
  0x36   : > { %4489 = vmatpush3.bf16.msra.mxu1 %v4486_v12  ;;  %4497 = vmatpush3.bf16.msra.mxu0 %v4494_v13 }
  0x37   : > { %4013 = vmatprep.mubr.msk.f32.mxu0 %vm448_vm0, %v431_v20  ;;  %4019 = vmatprep.mubr.msk.f32.mxu1 %vm448_vm0, %v435_v21 }
  0x38   : > { %4491 = vmatprep.subr.bf16.mxu1 %v4490_v22  ;;  %4499 = vmatprep.subr.bf16.mxu0 %v4498_v23 }
  0x39   : > { %4014 = vmatmul.mubr.msk.f32.gmra.mrb[2].mxu0 %vm448_vm0, %v432_v24  ;;  %4020 = vmatmul.mubr.msk.f32.gmra.mrb[2].mxu1 %vm448_vm0, %v436_v25 }
  0x3a   : > { %4493 = vmatpush3.bf16.msra.mxu1 %v4490_v22  ;;  %4501 = vmatpush3.bf16.msra.mxu0 %v4498_v23 }
  0x3b   : > { %4030 = vmatprep.mubr.msk.f32.mxu1 %vm448_vm0, %v429_v5  ;;  %4050 = vmatprep.mubr.msk.f32.mxu0 %vm448_vm0, %v429_v5 }
  0x3d   : > { %4031 = vmatmul.mubr.msk.f32.vlgmr.msra.gmra.mrb[4].mxu1 %vm448_vm0, %v430_v18  ;;  %4051 = vmatmul.mubr.msk.f32.vlgmr.msra.gmra.mrb[4].mxu0 %vm448_vm0, %v430_v18 }
  0x3e   : > { %4033 = vmatprep.mubr.msk.f32.mxu1 %vm448_vm0, %v431_v20  ;;  %4053 = vmatprep.mubr.msk.f32.mxu0 %vm448_vm0, %v431_v20 }
  0x41   : > { %4034 = vmatmul.mubr.msk.f32.gmra.mrb[6].mxu1 %vm448_vm0, %v432_v24  ;;  %4054 = vmatmul.mubr.msk.f32.gmra.mrb[6].mxu0 %vm448_vm0, %v432_v24 }
  0x42   : > { %4036 = vmatprep.mubr.msk.f32.mxu1 %vm448_vm0, %v433_v6  ;;  %4056 = vmatprep.mubr.msk.f32.mxu0 %vm448_vm0, %v433_v6 }
  0x45   : > { %4037 = vmatmul.mubr.msk.f32.gmra.mrb[8].mxu1 %vm448_vm0, %v434_v19  ;;  %4057 = vmatmul.mubr.msk.f32.gmra.mrb[8].mxu0 %vm448_vm0, %v434_v19 }
  0x46   : > { %4039 = vmatprep.mubr.msk.f32.mxu1 %vm448_vm0, %v435_v21  ;;  %4059 = vmatprep.mubr.msk.f32.mxu0 %vm448_vm0, %v435_v21 }
  0x49   : > { %4040 = vmatmul.mubr.msk.f32.gmra.mrb[10].mxu1 %vm448_vm0, %v436_v25  ;;  %4060 = vmatmul.mubr.msk.f32.gmra.mrb[10].mxu0 %vm448_vm0, %v436_v25 }
  0x4a   : > { %4078 = vmatprep.mubr.msk.f32.mxu1 %vm828_vm1, %v820_v26  ;;  %4106 = vmatprep.mubr.msk.f32.mxu0 %vm828_vm1, %v979_v27 }
 0x108   : > { %v5134_v28 = vpop.f32.mrb[0].mxu0  ;;  %v4018_v30 = vpop.f32.mrb[0].mxu1 }
 0x109   : > { %v539_v31 = vpop.f32.mrb[1].mxu0  ;;  %v5142_v32 = vadd.f32 %v4018_v30, %v5139_v29  ;;  %v5144_v33 = vpop.f32.mrb[1].mxu1 }
 0x10a   : > { %v5209_v16 = vadd.f32 %v5139_v29, %v539_v31  ;;  %v5238_v30 = vadd.f32 %v5139_v29, %v5144_v33  ;;  %v5245_v31 = vadd.f32 %v5134_v28, %v5139_v29  ;;  %v822_v33 = vld [vmem:[#allocation2 + $0x10] sm:$0xff]  ;;  %v823_v28 = vld [vmem:[#allocation2 + $0x18] sm:$0xff] }
 0x10c   : > { %v5146_v34 = vpop.f32.mrb[2].mxu0  ;;  %v4021_v35 = vpop.f32.mrb[2].mxu1 }
 0x10d   : > { %v5148_v36 = vpop.f32.mrb[3].mxu0  ;;  %v5151_v37 = vadd.f32 %v4021_v35, %v5139_v29  ;;  %v569_v38 = vpop.f32.mrb[3].mxu1  ;;  %v821_v35 = vld [vmem:[#allocation2 + $0x8] sm:$0xff] }
 0x10e   : > { %v5154_v39 = vadd.f32 %v5139_v29, %v569_v38  ;;  %v5231_v27 = vadd.f32 %v5139_v29, %v5148_v36  ;;  %v980_v36 = vld [vmem:[#allocation2 + $0x48] sm:$0xff]  ;;  %v5260_v38 = vadd.f32 %v5146_v34, %v5139_v29  ;;  %v983_v34 = vld [vmem:[#allocation2 + $0x60] sm:$0xff] }
 0x10f   : > { %v825_v29 = vld [vmem:[#allocation2 + $0x28] sm:$0xff] }
 0x110   : > { %v4032_v42 = vpop.f32.mrb[4].mxu1  ;;  %v4052_v43 = vpop.f32.mrb[4].mxu0 }
 0x111   : > { %v661_v44 = vadd.f32 %v4032_v42, %v3557_v40  ;;  %v5162_v45 = vadd.f32 %v4052_v43, %v3566_v41  ;;  %v655_v46 = vpop.f32.mrb[5].mxu1  ;;  %v771_v47 = vpop.f32.mrb[5].mxu0  ;;  %v824_v42 = vld [vmem:[#allocation2 + $0x20] sm:$0xff]  ;;  %v984_v43 = vld [vmem:[#allocation2 + $0x68] sm:$0xff] }
 0x112   : > { %v656_v48 = vadd.f32 %v3557_v40, %v655_v46  ;;  %v5164_v49 = vadd.f32 %v3566_v41, %v771_v47  ;;  %v827_v46 = vld [vmem:[#allocation2 + $0x38] sm:$0xff]  ;;  %v985_v47 = vld [vmem:[#allocation2 + $0x70] sm:$0xff] }
 0x114   : > { %v5166_v50 = vpack.c.bf16 %v661_v44, %v656_v48  ;;  %v4813_v51 = vpack.i.bf16 %v5162_v45, %v5164_v49  ;;  %v5172_v52 = vpack.c.bf16 %v5162_v45, %v5164_v49  ;;  %v4035_v53 = vpop.f32.mrb[6].mxu1  ;;  %v4055_v54 = vpop.f32.mrb[6].mxu0  ;;  %v4793_v55 = vpack.i.bf16 %v661_v44, %v656_v48  ;;  %v826_v44 = vld [vmem:[#allocation2 + $0x30] sm:$0xff]  ;;  %v986_v48 = vld [vmem:[#allocation2 + $0x78] sm:$0xff] }
 0x115   : > { %v671_v56 = vadd.f32 %v4035_v53, %v3557_v40  ;;  %v5174_v57 = vadd.f32 %v4055_v54, %v3566_v41  ;;  %v665_v58 = vpop.f32.mrb[7].mxu1  ;;  %v781_v59 = vpop.f32.mrb[7].mxu0  ;;  %v1137_v53 = vld [vmem:[#allocation2 + $0x80] sm:$0xff]  ;;  %v1138_v54 = vld [vmem:[#allocation2 + $0x88] sm:$0xff] }
 0x116   : > { %v666_v60 = vadd.f32 %v3557_v40, %v665_v58  ;;  %v5176_v61 = vadd.f32 %v3566_v41, %v781_v59  ;;  %4794 = vrot.lane.b32.xlu0 %v4793_v55, %s4940_s28  ;;  %4503 = vmatprep.subr.bf16.mxu1 %v5172_v52  ;;  %v1295_v55 = vld [vmem:[#allocation2 + $0xc0] sm:$0xff]  ;;  %v1139_v58 = vld [vmem:[#allocation2 + $0x90] sm:$0xff]  ;;  %v1140_v59 = vld [vmem:[#allocation2 + $0x98] sm:$0xff] }
 0x117   : > { %4519 = vmatprep.subr.bf16.mxu0 %v5172_v52  ;;  %4505 = vmatpush3.bf16.msra.mxu1 %v5172_v52 }
 0x118   : > { %v4798_v62 = vpack.i.bf16 %v671_v56, %v666_v60  ;;  %v5182_v63 = vpack.c.bf16 %v671_v56, %v666_v60  ;;  %v4818_v0 = vpack.i.bf16 %v5174_v57, %v5176_v61  ;;  %v5188_v1 = vpack.c.bf16 %v5174_v57, %v5176_v61  ;;  %4521 = vmatpush3.bf16.msra.mxu0 %v5172_v52  ;;  %v4038_v2 = vpop.f32.mrb[8].mxu1  ;;  %v4058_v3 = vpop.f32.mrb[8].mxu0  ;;  %v1296_v56 = vld [vmem:[#allocation2 + $0xc8] sm:$0xff]  ;;  %v1297_v60 = vld [vmem:[#allocation2 + $0xd0] sm:$0xff] }
 0x119   : > { %v681_v4 = vadd.f32 %v4038_v2, %v3557_v40  ;;  %v5191_v5 = vadd.f32 %v4058_v3, %v3566_v41  ;;  %v675_v6 = vpop.f32.mrb[9].mxu1  ;;  %v791_v7 = vpop.f32.mrb[9].mxu0  ;;  %v1141_v2 = vld [vmem:[#allocation2 + $0xa0] sm:$0xff]  ;;  %v1142_v3 = vld [vmem:[#allocation2 + $0xa8] sm:$0xff] }
 0x11a   : > { %v676_v8 = vadd.f32 %v3557_v40, %v675_v6  ;;  %v5193_v9 = vadd.f32 %v3566_v41, %v791_v7  ;;  %4799 = vrot.lane.b32.xlu0 %v4798_v62, %s4940_s28  ;;  %4507 = vmatprep.subr.bf16.mxu1 %v5188_v1  ;;  %v1298_v62 = vld [vmem:[#allocation2 + $0xd8] sm:$0xff]  ;;  %v1300_v6 = vld [vmem:[#allocation2 + $0xe8] sm:$0xff]  ;;  %v1143_v7 = vld [vmem:[#allocation2 + $0xb0] sm:$0xff] }
 0x11b   : > { %4523 = vmatprep.subr.bf16.mxu0 %v5188_v1  ;;  %4509 = vmatpush3.bf16.msra.mxu1 %v5188_v1 }
 0x11c   : > { %v5199_v10 = vpack.c.bf16 %v681_v4, %v676_v8  ;;  %v4823_v11 = vpack.i.bf16 %v5191_v5, %v5193_v9  ;;  %v5205_v12 = vpack.c.bf16 %v5191_v5, %v5193_v9  ;;  %4525 = vmatpush3.bf16.msra.mxu0 %v5188_v1  ;;  %v4041_v13 = vpop.f32.mrb[10].mxu1  ;;  %v4061_v14 = vpop.f32.mrb[10].mxu0  ;;  %v4803_v15 = vpack.i.bf16 %v681_v4, %v676_v8  ;;  %v1299_v4 = vld [vmem:[#allocation2 + $0xe0] sm:$0xff]  ;;  %v1144_v8 = vld [vmem:[#allocation2 + $0xb8] sm:$0xff] }
 0x11d   : > { %v691_v17 = vadd.f32 %v4041_v13, %v3557_v40  ;;  %v5211_v18 = vadd.f32 %v4061_v14, %v3566_v41  ;;  %v685_v19 = vpop.f32.mrb[11].mxu1  ;;  %v801_v20 = vpop.f32.mrb[11].mxu0  ;;  %v1301_v13 = vld [vmem:[#allocation2 + $0xf0] sm:$0xff]  ;;  %v1302_v14 = vld [vmem:[#allocation2 + $0xf8] sm:$0xff] }
 0x11e   : > { %v686_v21 = vadd.f32 %v3557_v40, %v685_v19  ;;  %v5213_v22 = vadd.f32 %v3566_v41, %v801_v20  ;;  %4804 = vrot.lane.b32.xlu1 %v4803_v15, %s4940_s28  ;;  %4511 = vmatprep.subr.bf16.mxu1 %v5205_v12  ;;  %v981_v40 = vld [vmem:[#allocation2 + $0x50] sm:$0xff]  ;;  %v982_v41 = vld [vmem:[#allocation2 + $0x58] sm:$0xff]  ;;  %v1453_v15 = vld [vmem:[#allocation2 + $0x100] sm:$0xff] }
 0x11f   : > { %4527 = vmatprep.subr.bf16.mxu0 %v5205_v12  ;;  %2899 = vrot.lane.b32.xlu0 %v5209_v16, %s4940_s28  ;;  %v1611_v19 = vld [vmem:[#allocation2 + $0x140] sm:$0xff]  ;;  %v1612_v20 = vld [vmem:[#allocation2 + $0x148] sm:$0xff] }
 0x120   : > { %v4808_v23 = vpack.i.bf16 %v691_v17, %v686_v21  ;;  %v5220_v24 = vpack.c.bf16 %v691_v17, %v686_v21  ;;  %v4828_v25 = vpack.i.bf16 %v5211_v18, %v5213_v22  ;;  %v5226_v26 = vpack.c.bf16 %v5211_v18, %v5213_v22  ;;  %4513 = vmatpush3.bf16.msra.mxu1 %v5205_v12  ;;  %v1454_v17 = vld [vmem:[#allocation2 + $0x108] sm:$0xff]  ;;  %v1455_v21 = vld [vmem:[#allocation2 + $0x110] sm:$0xff] }
 0x121   : > { %4529 = vmatpush3.bf16.msra.mxu0 %v5205_v12 }
 0x122   : > { %4809 = vrot.lane.b32.xlu1 %v4808_v23, %s4940_s28  ;;  %4515 = vmatprep.subr.bf16.mxu1 %v5226_v26  ;;  %v1456_v23 = vld [vmem:[#allocation2 + $0x118] sm:$0xff] }
 0x123   : > { %4531 = vmatprep.subr.bf16.mxu0 %v5226_v26  ;;  %2903 = vrot.lane.b32.xlu0 %v5231_v27, %s4940_s28 }
 0x124   : > { %4517 = vmatpush3.bf16.msra.mxu1 %v5226_v26 }
 0x125   : > { %4533 = vmatpush3.bf16.msra.mxu0 %v5226_v26  ;;  %4535 = vmatprep.subr.bf16.mxu1 %v5172_v52 }
 0x126   : > { %4551 = vmatprep.subr.bf16.mxu0 %v5172_v52  ;;  %2901 = vrot.lane.b32.xlu1 %v5245_v31, %s4940_s28 }
 0x127   : > { %4079 = vmatmul.mubr.msk.f32.vlgmr.msra.gmra.mrb[12].mxu1 %vm828_vm1, %v821_v35  ;;  %2907 = vrot.lane.b32.xlu0 %v5238_v30, %s4940_s28  ;;  %v1613_v35 = vld [vmem:[#allocation2 + $0x150] sm:$0xff] }
 0x128   : > { %4107 = vmatmul.mubr.msk.f32.vlgmr.msra.gmra.mrb[12].mxu0 %vm828_vm1, %v980_v36  ;;  %4537 = vmatpush3.bf16.msra.mxu1 %v5172_v52  ;;  %v1614_v36 = vld [vmem:[#allocation2 + $0x158] sm:$0xff] }
 0x129   : > { %4553 = vmatpush3.bf16.msra.mxu0 %v5172_v52  ;;  %4539 = vmatprep.subr.bf16.mxu1 %v5188_v1 }
 0x12a   : > { %4555 = vmatprep.subr.bf16.mxu0 %v5188_v1  ;;  %4081 = vmatprep.mubr.msk.f32.mxu1 %vm828_vm1, %v822_v33  ;;  %v1457_v33 = vld [vmem:[#allocation2 + $0x120] sm:$0xff] }
 0x12b   : > { %2905 = vrot.lane.b32.xlu1 %v5260_v38, %s4940_s28  ;;  %4082 = vmatmul.mubr.msk.f32.gmra.mrb[14].mxu1 %vm828_vm1, %v823_v28  ;;  %v1458_v28 = vld [vmem:[#allocation2 + $0x128] sm:$0xff] }
 0x12c   : > { %4109 = vmatprep.mubr.msk.f32.mxu0 %vm828_vm1, %v981_v40  ;;  %4541 = vmatpush3.bf16.msra.mxu1 %v5188_v1  ;;  %v1615_v40 = vld [vmem:[#allocation2 + $0x160] sm:$0xff] }
 0x12d   : > { %4110 = vmatmul.mubr.msk.f32.gmra.mrb[14].mxu0 %vm828_vm1, %v982_v41  ;;  %4543 = vmatprep.subr.bf16.mxu1 %v5205_v12  ;;  %v1616_v41 = vld [vmem:[#allocation2 + $0x168] sm:$0xff] }
 0x12e   : > { %4557 = vmatpush3.bf16.msra.mxu0 %v5188_v1  ;;  %4084 = vmatprep.mubr.msk.f32.mxu1 %vm828_vm1, %v824_v42  ;;  %v1459_v42 = vld [vmem:[#allocation2 + $0x130] sm:$0xff] }
 0x12f   : > { %4559 = vmatprep.subr.bf16.mxu0 %v5205_v12  ;;  %4085 = vmatmul.mubr.msk.f32.gmra.mrb[16].mxu1 %vm828_vm1, %v825_v29  ;;  %v1460_v29 = vld [vmem:[#allocation2 + $0x138] sm:$0xff] }
 0x130   : > { %4112 = vmatprep.mubr.msk.f32.mxu0 %vm828_vm1, %v983_v34  ;;  %4545 = vmatpush3.bf16.msra.mxu1 %v5205_v12  ;;  %v1617_v34 = vld [vmem:[#allocation2 + $0x170] sm:$0xff] }
 0x131   : > { %4113 = vmatmul.mubr.msk.f32.gmra.mrb[16].mxu0 %vm828_vm1, %v984_v43  ;;  %4547 = vmatprep.subr.bf16.mxu1 %v5226_v26  ;;  %v2242_v43 = vld [vmem:[%s5746_s10] sm:$0xff] }
 0x132   : > { %4561 = vmatpush3.bf16.msra.mxu0 %v5205_v12  ;;  %4087 = vmatprep.mubr.msk.f32.mxu1 %vm828_vm1, %v826_v44  ;;  %v2243_v44 = vld [vmem:[%s5746_s10 + $0x8] sm:$0xff] }
 0x133   : > { %4563 = vmatprep.subr.bf16.mxu0 %v5226_v26  ;;  %4088 = vmatmul.mubr.msk.f32.gmra.mrb[18].mxu1 %vm828_vm1, %v827_v46  ;;  %v1618_v46 = vld [vmem:[#allocation2 + $0x178] sm:$0xff] }
 0x134   : > { %4115 = vmatprep.mubr.msk.f32.mxu0 %vm828_vm1, %v985_v47  ;;  %4549 = vmatpush3.bf16.msra.mxu1 %v5226_v26  ;;  %v1769_v47 = vld [vmem:[#allocation2 + $0x180] sm:$0xff] }
 0x135   : > { %4116 = vmatmul.mubr.msk.f32.gmra.mrb[18].mxu0 %vm828_vm1, %v986_v48  ;;  %4567 = vmatprep.subr.bf16.mxu1 %v5172_v52  ;;  %v1770_v48 = vld [vmem:[#allocation2 + $0x188] sm:$0xff] }
 0x136   : > { %4565 = vmatpush3.bf16.msra.mxu0 %v5226_v26  ;;  %4134 = vmatprep.mubr.msk.f32.mxu1 %vm828_vm1, %v1137_v53  ;;  %v1927_v53 = vld [vmem:[#allocation2 + $0x1c0] sm:$0xff] }
 0x137   : > { %4583 = vmatprep.subr.bf16.mxu0 %v5172_v52  ;;  %4135 = vmatmul.mubr.msk.f32.vlgmr.msra.gmra.mrb[20].mxu1 %vm828_vm1, %v1138_v54  ;;  %v5357_v54 = vpack.c.bf16 %v2243_v44, %v2242_v43 }
 0x138   : > { %4162 = vmatprep.mubr.msk.f32.mxu0 %vm828_vm1, %v1295_v55  ;;  %4569 = vmatpush3.bf16.msra.mxu1 %v5172_v52  ;;  %v2244_v55 = vld [vmem:[%s5746_s10 + $0x10] sm:$0xff] }
 0x139   : > { %4163 = vmatmul.mubr.msk.f32.vlgmr.msra.gmra.mrb[20].mxu0 %vm828_vm1, %v1296_v56  ;;  %4571 = vmatprep.subr.bf16.mxu1 %v5188_v1  ;;  %v2245_v56 = vld [vmem:[%s5746_s10 + $0x18] sm:$0xff] }
 0x13a   : > { %4585 = vmatpush3.bf16.msra.mxu0 %v5172_v52  ;;  %4137 = vmatprep.mubr.msk.f32.mxu1 %vm828_vm1, %v1139_v58  ;;  %v1928_v58 = vld [vmem:[#allocation2 + $0x1c8] sm:$0xff] }
 0x13b   : > { %4587 = vmatprep.subr.bf16.mxu0 %v5188_v1  ;;  %4138 = vmatmul.mubr.msk.f32.gmra.mrb[22].mxu1 %vm828_vm1, %v1140_v59  ;;  %v1771_v59 = vld [vmem:[#allocation2 + $0x190] sm:$0xff] }
 0x13c   : > { %4165 = vmatprep.mubr.msk.f32.mxu0 %vm828_vm1, %v1297_v60  ;;  %4573 = vmatpush3.bf16.msra.mxu1 %v5188_v1  ;;  %v5371_v60 = vpack.c.bf16 %v2245_v56, %v2244_v55 }
 0x13d   : > { %4166 = vmatmul.mubr.msk.f32.gmra.mrb[22].mxu0 %vm828_vm1, %v1298_v62  ;;  %4575 = vmatprep.subr.bf16.mxu1 %v5205_v12  ;;  %v1772_v62 = vld [vmem:[#allocation2 + $0x198] sm:$0xff] }
 0x13e   : > { %4589 = vmatpush3.bf16.msra.mxu0 %v5188_v1  ;;  %4140 = vmatprep.mubr.msk.f32.mxu1 %vm828_vm1, %v1141_v2  ;;  %v1929_v2 = vld [vmem:[#allocation2 + $0x1d0] sm:$0xff] }
 0x13f   : > { %4591 = vmatprep.subr.bf16.mxu0 %v5205_v12  ;;  %4141 = vmatmul.mubr.msk.f32.gmra.mrb[24].mxu1 %vm828_vm1, %v1142_v3  ;;  %v1930_v3 = vld [vmem:[#allocation2 + $0x1d8] sm:$0xff] }
 0x140   : > { %4168 = vmatprep.mubr.msk.f32.mxu0 %vm828_vm1, %v1299_v4  ;;  %4577 = vmatpush3.bf16.msra.mxu1 %v5205_v12  ;;  %v1773_v4 = vld [vmem:[#allocation2 + $0x1a0] sm:$0xff] }
 0x141   : > { %4169 = vmatmul.mubr.msk.f32.gmra.mrb[24].mxu0 %vm828_vm1, %v1300_v6  ;;  %4579 = vmatprep.subr.bf16.mxu1 %v5226_v26  ;;  %v1774_v6 = vld [vmem:[#allocation2 + $0x1a8] sm:$0xff] }
 0x142   : > { %4593 = vmatpush3.bf16.msra.mxu0 %v5205_v12  ;;  %4143 = vmatprep.mubr.msk.f32.mxu1 %vm828_vm1, %v1143_v7  ;;  %v1931_v7 = vld [vmem:[#allocation2 + $0x1e0] sm:$0xff] }
 0x143   : > { %4595 = vmatprep.subr.bf16.mxu0 %v5226_v26  ;;  %4144 = vmatmul.mubr.msk.f32.gmra.mrb[26].mxu1 %vm828_vm1, %v1144_v8  ;;  %v1932_v8 = vld [vmem:[#allocation2 + $0x1e8] sm:$0xff] }
 0x144   : > { %4171 = vmatprep.mubr.msk.f32.mxu0 %vm828_vm1, %v1301_v13  ;;  %4581 = vmatpush3.bf16.msra.mxu1 %v5226_v26  ;;  %v1775_v13 = vld [vmem:[#allocation2 + $0x1b0] sm:$0xff] }
 0x145   : > { %4172 = vmatmul.mubr.msk.f32.gmra.mrb[26].mxu0 %vm828_vm1, %v1302_v14  ;;  %4599 = vmatprep.subr.bf16.mxu1 %v5172_v52  ;;  %v1776_v14 = vld [vmem:[#allocation2 + $0x1b8] sm:$0xff] }
 0x146   : > { %4597 = vmatpush3.bf16.msra.mxu0 %v5226_v26  ;;  %4190 = vmatprep.mubr.msk.f32.mxu1 %vm828_vm1, %v1453_v15  ;;  %v1933_v15 = vld [vmem:[#allocation2 + $0x1f0] sm:$0xff] }
 0x147   : > { %4615 = vmatprep.subr.bf16.mxu0 %v5172_v52  ;;  %4191 = vmatmul.mubr.msk.f32.vlgmr.msra.gmra.mrb[28].mxu1 %vm828_vm1, %v1454_v17  ;;  %v1934_v17 = vld [vmem:[#allocation2 + $0x1f8] sm:$0xff] }
 0x148   : > { %4218 = vmatprep.mubr.msk.f32.mxu0 %vm828_vm1, %v1611_v19  ;;  %4601 = vmatpush3.bf16.msra.mxu1 %v5172_v52  ;;  %v2085_v19 = vld [vmem:[#allocation2 + $0x200] sm:$0xff] }
 0x149   : > { %4219 = vmatmul.mubr.msk.f32.vlgmr.msra.gmra.mrb[28].mxu0 %vm828_vm1, %v1612_v20  ;;  %4603 = vmatprep.subr.bf16.mxu1 %v5188_v1 }
 0x14a   : > { %4617 = vmatpush3.bf16.msra.mxu0 %v5172_v52  ;;  %4193 = vmatprep.mubr.msk.f32.mxu1 %vm828_vm1, %v1455_v21  ;;  %v2086_v21 = vld [vmem:[#allocation2 + $0x208] sm:$0xff] }
 0x14b   : > { %4619 = vmatprep.subr.bf16.mxu0 %v5188_v1  ;;  %4194 = vmatmul.mubr.msk.f32.gmra.mrb[30].mxu1 %vm828_vm1, %v1456_v23  ;;  %v2087_v23 = vld [vmem:[#allocation2 + $0x210] sm:$0xff] }
 0x14c   : > { %4221 = vmatprep.mubr.msk.f32.mxu0 %vm828_vm1, %v1613_v35  ;;  %4605 = vmatpush3.bf16.msra.mxu1 %v5188_v1  ;;  %v2088_v35 = vld [vmem:[#allocation2 + $0x218] sm:$0xff] }
 0x14d   : > { %4222 = vmatmul.mubr.msk.f32.gmra.mrb[30].mxu0 %vm828_vm1, %v1614_v36  ;;  %4607 = vmatprep.subr.bf16.mxu1 %v5205_v12  ;;  %v2089_v36 = vld [vmem:[#allocation2 + $0x220] sm:$0xff] }
 0x14e   : > { %4621 = vmatpush3.bf16.msra.mxu0 %v5188_v1  ;;  %4196 = vmatprep.mubr.msk.f32.mxu1 %vm828_vm1, %v1457_v33  ;;  %v2090_v33 = vld [vmem:[#allocation2 + $0x228] sm:$0xff] }
 0x14f   : > { %4623 = vmatprep.subr.bf16.mxu0 %v5205_v12  ;;  %4197 = vmatmul.mubr.msk.f32.gmra.mrb[32].mxu1 %vm828_vm1, %v1458_v28  ;;  %v2091_v28 = vld [vmem:[#allocation2 + $0x230] sm:$0xff] }
 0x150   : > { %4224 = vmatprep.mubr.msk.f32.mxu0 %vm828_vm1, %v1615_v40  ;;  %4609 = vmatpush3.bf16.msra.mxu1 %v5205_v12  ;;  %v2092_v40 = vld [vmem:[#allocation2 + $0x238] sm:$0xff] }
 0x151   : > { %4225 = vmatmul.mubr.msk.f32.gmra.mrb[32].mxu0 %vm828_vm1, %v1616_v41  ;;  %4611 = vmatprep.subr.bf16.mxu1 %v5226_v26 }
 0x152   : > { %4625 = vmatpush3.bf16.msra.mxu0 %v5205_v12  ;;  %4199 = vmatprep.mubr.msk.f32.mxu1 %vm828_vm1, %v1459_v42 }
 0x153   : > { %4627 = vmatprep.subr.bf16.mxu0 %v5226_v26  ;;  %4200 = vmatmul.mubr.msk.f32.gmra.mrb[34].mxu1 %vm828_vm1, %v1460_v29 }
 0x154   : > { %4227 = vmatprep.mubr.msk.f32.mxu0 %vm828_vm1, %v1617_v34  ;;  %4613 = vmatpush3.bf16.msra.mxu1 %v5226_v26 }
 0x155   : > { %4228 = vmatmul.mubr.msk.f32.gmra.mrb[34].mxu0 %vm828_vm1, %v1618_v46  ;;  %4631 = vmatprep.subr.bf16.mxu1 %v5172_v52 }
 0x156   : > { %4629 = vmatpush3.bf16.msra.mxu0 %v5226_v26  ;;  %4246 = vmatprep.mubr.msk.f32.mxu1 %vm828_vm1, %v1769_v47 }
 0x157   : > { %4247 = vmatmul.mubr.msk.f32.vlgmr.msra.gmra.mrb[36].mxu1 %vm828_vm1, %v1770_v48  ;;  %4274 = vmatprep.mubr.msk.f32.mxu0 %vm828_vm1, %v1927_v53 }
 0x158   : > { %4647 = vmatprep.subr.bf16.mxu0 %v5357_v54  ;;  %4633 = vmatpush3.bf16.msra.mxu1 %v5172_v52 }
 0x159   : > { %4275 = vmatmul.mubr.msk.f32.vlgmr.msra.gmra.mrb[36].mxu0 %vm828_vm1, %v1928_v58  ;;  %4635 = vmatprep.subr.bf16.mxu1 %v5188_v1  ;;  %v958_v58 = vlaneseq }
 0x15a   : > { %4649 = vmatpush3.bf16.msra.mxu0 %v5357_v54  ;;  %4249 = vmatprep.mubr.msk.f32.mxu1 %vm828_vm1, %v1771_v59 }
 0x15b   : > { %4250 = vmatmul.mubr.msk.f32.gmra.mrb[38].mxu1 %vm828_vm1, %v1772_v62  ;;  %4651 = vmatprep.subr.bf16.mxu0 %v5371_v60  ;;  %v5482_v59 = vshrl.u32 %v958_v58, 7 }
 0x15c   : > { %4277 = vmatprep.mubr.msk.f32.mxu0 %vm828_vm1, %v1929_v2  ;;  %4637 = vmatpush3.bf16.msra.mxu1 %v5188_v1  ;;  %v5488_v2 = vld [vmem:[%s5744_s8] sm:$0xff] }
 0x15d   : > { %4278 = vmatmul.mubr.msk.f32.gmra.mrb[38].mxu0 %vm828_vm1, %v1930_v3  ;;  %4639 = vmatprep.subr.bf16.mxu1 %v5205_v12  ;;  %v960_v62 = vsub.s32 0, %v5482_v59  ;;  %v1118_v3 = vsub.s32 1, %v5482_v59 }
 0x15e   : > { %4653 = vmatpush3.bf16.msra.mxu0 %v5371_v60  ;;  %4252 = vmatprep.mubr.msk.f32.mxu1 %vm828_vm1, %v1773_v4 }
 0x15f   : > { %4679 = vmatprep.subr.bf16.mxu0 %v5172_v52  ;;  %4253 = vmatmul.mubr.msk.f32.gmra.mrb[40].mxu1 %vm828_vm1, %v1774_v6  ;;  %v961_v4 = vrot.slane %v5488_v2, %v960_v62  ;;  %v1119_v6 = vrot.slane %v5488_v2, %v1118_v3 }
 0x160   : > { %4280 = vmatprep.mubr.msk.f32.mxu0 %vm828_vm1, %v1931_v7  ;;  %4641 = vmatpush3.bf16.msra.mxu1 %v5205_v12  ;;  %v3575_v7 = vld [vmem:[%s5745_s9] ss:$0 sm:$0xff] }
 0x161   : > { %2909 = vrot.lane.b32.xlu1 %v5142_v32, %s4940_s28  ;;  %4281 = vmatmul.mubr.msk.f32.gmra.mrb[40].mxu0 %vm828_vm1, %v1932_v8 }
 0x162   : > { %4643 = vmatprep.subr.bf16.mxu1 %v5226_v26  ;;  %4255 = vmatprep.mubr.msk.f32.mxu1 %vm828_vm1, %v1775_v13 }
 0x163   : > { %4256 = vmatmul.mubr.msk.f32.gmra.mrb[42].mxu1 %vm828_vm1, %v1776_v14  ;;  %4283 = vmatprep.mubr.msk.f32.mxu0 %vm828_vm1, %v1933_v15 }
 0x164   : > { %4645 = vmatpush3.bf16.msra.mxu1 %v5226_v26  ;;  %2911 = vrot.lane.b32.xlu0 %v5154_v39, %s4940_s28 }
 0x165   : > { %2913 = vrot.lane.b32.xlu1 %v5151_v37, %s4940_s28  ;;  %4284 = vmatmul.mubr.msk.f32.gmra.mrb[42].mxu0 %vm828_vm1, %v1934_v17  ;;  %s4941_s28 = smov 112  }
 0x166   : > { %4302 = vmatprep.mubr.msk.f32.mxu1 %vm828_vm1, %v2085_v19  ;;  %4656 = vmatprep.subr.msk.bf16.mxu1 %vm5400_vm3, %v5166_v50 }
 0x167   : > { %4303 = vmatmul.mubr.msk.f32.vlgmr.msra.gmra.mrb[44].mxu1 %vm828_vm1, %v2086_v21 }
 0x168   : > { %4305 = vmatprep.mubr.msk.f32.mxu1 %vm828_vm1, %v2087_v23 }
 0x16b   : > { %4306 = vmatmul.mubr.msk.f32.gmra.mrb[46].mxu1 %vm828_vm1, %v2088_v35 }
 0x16c   : > { %4308 = vmatprep.mubr.msk.f32.mxu1 %vm828_vm1, %v2089_v36 }
 0x16d   : > { %4659 = vmatpush3.bf16.xpose.msk.msra.mxu1 %vm5400_vm3, %v5166_v50 }
 0x16e   : > { %4662 = vmatprep.subr.msk.bf16.mxu1 %vm5400_vm3, %v5182_v63 }
 0x16f   : > { %4309 = vmatmul.mubr.msk.f32.gmra.mrb[48].mxu1 %vm828_vm1, %v2090_v33 }
 0x170   : > { %4311 = vmatprep.mubr.msk.f32.mxu1 %vm828_vm1, %v2091_v28 }
 0x173   : > { %4312 = vmatmul.mubr.msk.f32.gmra.mrb[50].mxu1 %vm828_vm1, %v2092_v40 }
 0x174   : > { %4350 = vmatprep.mubr.msk.f32.mxu1 %vm2382_vm2, %v5209_v16 }
 0x175   : > { %4665 = vmatpush3.bf16.xpose.msk.msra.mxu1 %vm5400_vm3, %v5182_v63 }
 0x176   : > { %4668 = vmatprep.subr.msk.bf16.mxu1 %vm5400_vm3, %v5199_v10 }
 0x17d   : > { %4671 = vmatpush3.bf16.xpose.msk.msra.mxu1 %vm5400_vm3, %v5199_v10 }
 0x17e   : > { %4674 = vmatprep.subr.msk.bf16.mxu1 %vm5400_vm3, %v5220_v24 }
 0x185   : > { %4677 = vmatpush3.bf16.xpose.msk.msra.mxu1 %vm5400_vm3, %v5220_v24 }
 0x188   : > { %v4795_v50 = vpop.permute.xlu0 %4794 }
 0x189   : > { %v4797_v16 = vunpack.i.h.bf16 %v4795_v50  ;;  %v4796_v41 = vunpack.i.l.bf16 %v4795_v50 }
 0x18b   : > { %v4698_v63 = vpack.c.bf16 %v4797_v16, %v4796_v41 }
 0x18c   : > { %4351 = vmatmul.mubr.msk.f32.vlgmr.msra.gmra.mrb[52].mxu1 %vm2382_vm2, %v5245_v31  ;;  %v4800_v42 = vpop.permute.xlu0 %4799 }
 0x18d   : > { %v4802_v29 = vunpack.i.h.bf16 %v4800_v42  ;;  %v4801_v34 = vunpack.i.l.bf16 %v4800_v42  ;;  %4353 = vmatprep.mubr.msk.f32.mxu1 %vm2382_vm2, %v5231_v27  ;;  %4700 = vmatprep.subr.msk.bf16.mxu1 %vm5400_vm3, %v4698_v63 }
 0x18e   : > { %4703 = vmatpush3.bf16.xpose.msk.msra.mxu1 %vm5400_vm3, %v4698_v63 }
 0x18f   : > { %v4704_v10 = vpack.c.bf16 %v4802_v29, %v4801_v34 }
 0x190   : > { %4354 = vmatmul.mubr.msk.f32.gmra.mrb[54].mxu1 %vm2382_vm2, %v5260_v38  ;;  %v4805_v24 = vpop.permute.xlu1 %4804 }
 0x191   : > { %v4807_v43 = vunpack.i.h.bf16 %v4805_v24  ;;  %v4806_v44 = vunpack.i.l.bf16 %v4805_v24  ;;  %4356 = vmatprep.mubr.msk.f32.mxu1 %vm2382_vm2, %v5238_v30  ;;  %4706 = vmatprep.subr.msk.bf16.mxu1 %vm5400_vm3, %v4704_v10  ;;  %v2900_v30 = vpop.permute.xlu0 %2899 }
 0x193   : > { %v4710_v27 = vpack.c.bf16 %v4807_v43, %v4806_v44 }
 0x194   : > { %4357 = vmatmul.mubr.msk.f32.gmra.mrb[56].mxu1 %vm2382_vm2, %v5142_v32  ;;  %v4810_v31 = vpop.permute.xlu1 %4809 }
 0x195   : > { %4359 = vmatprep.mubr.msk.f32.mxu1 %vm2382_vm2, %v5154_v39  ;;  %v4812_v38 = vunpack.i.h.bf16 %v4810_v31  ;;  %v4811_v46 = vunpack.i.l.bf16 %v4810_v31  ;;  %v2904_v39 = vpop.permute.xlu0 %2903  ;;  %v1276_v31 = vsub.s32 2, %v5482_v59 }
 0x196   : > { %4709 = vmatpush3.bf16.xpose.msk.msra.mxu1 %vm5400_vm3, %v4704_v10 }
 0x197   : > { %4712 = vmatprep.subr.msk.bf16.mxu1 %vm5400_vm3, %v4710_v27  ;;  %v4716_v47 = vpack.c.bf16 %v4812_v38, %v4811_v46  ;;  %v1277_v3 = vrot.slane %v5488_v2, %v1276_v31 }
 0x198   : > { %4360 = vmatmul.mubr.msk.f32.gmra.mrb[58].mxu1 %vm2382_vm2, %v5151_v37  ;;  %v2902_v32 = vpop.permute.xlu1 %2901 }
 0x199   : > { %4422 = vmatprep.mubr.msk.f32.mxu1 %vm2382_vm2, %v2900_v30  ;;  %v2908_v48 = vpop.permute.xlu0 %2907 }
 0x19d   : > { %v2906_v37 = vpop.permute.xlu1 %2905 }
 0x19e   : > { %4715 = vmatpush3.bf16.xpose.msk.msra.mxu1 %vm5400_vm3, %v4710_v27 }
 0x19f   : > { %4718 = vmatprep.subr.msk.bf16.mxu1 %vm5400_vm3, %v4716_v47 }
 0x1a6   : > { %4721 = vmatpush3.bf16.xpose.msk.msra.mxu1 %vm5400_vm3, %v4716_v47 }
 0x1ad   : > { %4423 = vmatmul.mubr.msk.f32.vlgmr.msra.gmra.mrb[60].mxu1 %vm2382_vm2, %v2902_v32 }
 0x1ae   : > { %4425 = vmatprep.mubr.msk.f32.mxu1 %vm2382_vm2, %v2904_v39 }
 0x1b1   : > { %4426 = vmatmul.mubr.msk.f32.gmra.mrb[62].mxu1 %vm2382_vm2, %v2906_v37 }
 0x1b2   : > { %4428 = vmatprep.mubr.msk.f32.mxu1 %vm2382_vm2, %v2908_v48  ;;  %v1434_v48 = vsub.s32 3, %v5482_v59 }
 0x1d3   : > { %v2910_v53 = vpop.permute.xlu1 %2909 }
 0x1d4   : > { %4429 = vmatmul.mubr.msk.f32.gmra.mrb[64].mxu1 %vm2382_vm2, %v2910_v53 }
 0x1d6   : > { %v2912_v55 = vpop.permute.xlu0 %2911 }
 0x1d7   : > { %v2914_v56 = vpop.permute.xlu1 %2913  ;;  %4431 = vmatprep.mubr.msk.f32.mxu1 %vm2382_vm2, %v2912_v55 }
 0x1d8   : > { %4432 = vmatmul.mubr.msk.f32.gmra.mrb[66].mxu1 %vm2382_vm2, %v2914_v56 }
 0x1fa   : > { %v4080_v8 = vpop.f32.mrb[12].mxu1 }
 0x1fb   : > { %v963_v13 = vmul.f32 %v4080_v8, %v961_v4  ;;  %v919_v14 = vpop.f32.mrb[13].mxu1  ;;  %v4108_v15 = vpop.f32.mrb[12].mxu0 }
 0x1fc   : > { %v962_v17 = vmul.f32 %v961_v4, %v919_v14  ;;  %v1121_v19 = vmul.f32 %v4108_v15, %v1119_v6  ;;  %v1077_v20 = vpop.f32.mrb[13].mxu0 }
 0x1fd   : > { %v971_v21 = vadd.f32 %v3575_v7, %v963_v13  ;;  %v1120_v23 = vmul.f32 %v1119_v6, %v1077_v20  ;;  %v1435_v20 = vrot.slane %v5488_v2, %v1434_v48 }
 0x1fe   : > { %v970_v35 = vadd.f32 %v3575_v7, %v962_v17  ;;  %v4083_v36 = vpop.f32.mrb[14].mxu1 }
 0x1ff   : > { %v1129_v33 = vadd.f32 %v1121_v19, %v971_v21  ;;  %v965_v28 = vmul.f32 %v4083_v36, %v961_v4  ;;  %v929_v40 = vpop.f32.mrb[15].mxu1 }
 0x200   : > { %v1128_v50 = vadd.f32 %v1120_v23, %v970_v35  ;;  %v964_v16 = vmul.f32 %v961_v4, %v929_v40  ;;  %v4111_v41 = vpop.f32.mrb[14].mxu0 }
 0x201   : > { %v973_v63 = vadd.f32 %v3575_v7, %v965_v28  ;;  %v1123_v42 = vmul.f32 %v4111_v41, %v1119_v6  ;;  %v1087_v29 = vpop.f32.mrb[15].mxu0 }
 0x202   : > { %v972_v34 = vadd.f32 %v3575_v7, %v964_v16  ;;  %v1122_v10 = vmul.f32 %v1119_v6, %v1087_v29  ;;  %v4086_v24 = vpop.f32.mrb[16].mxu1 }
 0x203   : > { %v1131_v43 = vadd.f32 %v1123_v42, %v973_v63  ;;  %v967_v44 = vmul.f32 %v4086_v24, %v961_v4  ;;  %v939_v27 = vpop.f32.mrb[17].mxu1 }
 0x204   : > { %v1130_v38 = vadd.f32 %v1122_v10, %v972_v34  ;;  %v966_v46 = vmul.f32 %v961_v4, %v939_v27  ;;  %v4114_v30 = vpop.f32.mrb[16].mxu0 }
 0x205   : > { %v975_v47 = vadd.f32 %v3575_v7, %v967_v44  ;;  %v1125_v32 = vmul.f32 %v4114_v30, %v1119_v6  ;;  %v1097_v39 = vpop.f32.mrb[17].mxu0 }
 0x206   : > { %v974_v37 = vadd.f32 %v3575_v7, %v966_v46  ;;  %v1124_v53 = vmul.f32 %v1119_v6, %v1097_v39  ;;  %v4089_v55 = vpop.f32.mrb[18].mxu1 }
 0x207   : > { %v1133_v56 = vadd.f32 %v1125_v32, %v975_v47  ;;  %v969_v58 = vmul.f32 %v4089_v55, %v961_v4  ;;  %v949_v62 = vpop.f32.mrb[19].mxu1 }
 0x208   : > { %v1132_v8 = vadd.f32 %v1124_v53, %v974_v37  ;;  %v968_v13 = vmul.f32 %v961_v4, %v949_v62  ;;  %v4117_v14 = vpop.f32.mrb[18].mxu0 }
 0x209   : > { %v977_v15 = vadd.f32 %v3575_v7, %v969_v58  ;;  %v1127_v17 = vmul.f32 %v4117_v14, %v1119_v6  ;;  %v1107_v19 = vpop.f32.mrb[19].mxu0  ;;  %v1592_v58 = vsub.s32 4, %v5482_v59 }
 0x20a   : > { %v976_v21 = vadd.f32 %v3575_v7, %v968_v13  ;;  %v1126_v23 = vmul.f32 %v1119_v6, %v1107_v19  ;;  %v4136_v35 = vpop.f32.mrb[20].mxu1  ;;  %v1750_v19 = vsub.s32 5, %v5482_v59 }
 0x20b   : > { %v1135_v36 = vadd.f32 %v1127_v17, %v977_v15  ;;  %v1279_v28 = vmul.f32 %v4136_v35, %v1277_v3  ;;  %v1235_v40 = vpop.f32.mrb[21].mxu1 }
 0x20c   : > { %v1134_v16 = vadd.f32 %v1126_v23, %v976_v21  ;;  %v1278_v41 = vmul.f32 %v1277_v3, %v1235_v40  ;;  %v4164_v63 = vpop.f32.mrb[20].mxu0  ;;  %v1593_v40 = vrot.slane %v5488_v2, %v1592_v58 }
 0x20d   : > { %v1287_v42 = vadd.f32 %v1279_v28, %v1129_v33  ;;  %v1437_v29 = vmul.f32 %v4164_v63, %v1435_v20  ;;  %v1393_v34 = vpop.f32.mrb[21].mxu0 }
 0x20e   : > { %v1286_v10 = vadd.f32 %v1278_v41, %v1128_v50  ;;  %v1436_v4 = vmul.f32 %v1435_v20, %v1393_v34  ;;  %v4139_v24 = vpop.f32.mrb[22].mxu1 }
 0x20f   : > { %v1445_v44 = vadd.f32 %v1437_v29, %v1287_v42  ;;  %v1281_v27 = vmul.f32 %v4139_v24, %v1277_v3  ;;  %v1245_v31 = vpop.f32.mrb[23].mxu1 }
 0x210   : > { %v1444_v46 = vadd.f32 %v1436_v4, %v1286_v10  ;;  %v1280_v30 = vmul.f32 %v1277_v3, %v1245_v31  ;;  %v4167_v7 = vpop.f32.mrb[22].mxu0 }
 0x211   : > { %v1289_v6 = vadd.f32 %v1281_v27, %v1131_v43  ;;  %v1439_v47 = vmul.f32 %v4167_v7, %v1435_v20  ;;  %v1403_v32 = vpop.f32.mrb[23].mxu0 }
 0x212   : > { %v1288_v39 = vadd.f32 %v1280_v30, %v1130_v38  ;;  %v1438_v48 = vmul.f32 %v1435_v20, %v1403_v32  ;;  %v4142_v37 = vpop.f32.mrb[24].mxu1 }
 0x213   : > { %v1447_v53 = vadd.f32 %v1439_v47, %v1289_v6  ;;  %v1283_v55 = vmul.f32 %v4142_v37, %v1277_v3  ;;  %v1255_v33 = vpop.f32.mrb[25].mxu1 }
 0x214   : > { %v1446_v50 = vadd.f32 %v1438_v48, %v1288_v39  ;;  %v1282_v62 = vmul.f32 %v1277_v3, %v1255_v33  ;;  %v4170_v13 = vpop.f32.mrb[24].mxu0 }
 0x215   : > { %v1291_v14 = vadd.f32 %v1283_v55, %v1133_v56  ;;  %v1441_v15 = vmul.f32 %v4170_v13, %v1435_v20  ;;  %v1413_v17 = vpop.f32.mrb[25].mxu0  ;;  %v1751_v56 = vrot.slane %v5488_v2, %v1750_v19 }
 0x216   : > { %v1290_v21 = vadd.f32 %v1282_v62, %v1132_v8  ;;  %v1440_v43 = vmul.f32 %v1435_v20, %v1413_v17  ;;  %v4145_v23 = vpop.f32.mrb[26].mxu1 }
 0x217   : > { %v1449_v35 = vadd.f32 %v1441_v15, %v1291_v14  ;;  %v1285_v38 = vmul.f32 %v4145_v23, %v1277_v3  ;;  %v1265_v28 = vpop.f32.mrb[27].mxu1 }
 0x218   : > { %v1448_v41 = vadd.f32 %v1440_v43, %v1290_v21  ;;  %v1284_v63 = vmul.f32 %v1277_v3, %v1265_v28  ;;  %v4173_v42 = vpop.f32.mrb[26].mxu0 }
 0x219   : > { %v1293_v29 = vadd.f32 %v1285_v38, %v1135_v36  ;;  %v1443_v34 = vmul.f32 %v4173_v42, %v1435_v20  ;;  %v1423_v10 = vpop.f32.mrb[27].mxu0  ;;  %v1908_v38 = vsub.s32 6, %v5482_v59 }
 0x21a   : > { %v1292_v4 = vadd.f32 %v1284_v63, %v1134_v16  ;;  %v1442_v24 = vmul.f32 %v1435_v20, %v1423_v10  ;;  %v4192_v27 = vpop.f32.mrb[28].mxu1  ;;  %v2066_v10 = vsub.s32 7, %v5482_v59 }
 0x21b   : > { %v1451_v31 = vadd.f32 %v1443_v34, %v1293_v29  ;;  %v1595_v8 = vmul.f32 %v4192_v27, %v1593_v40  ;;  %v1551_v30 = vpop.f32.mrb[29].mxu1 }
 0x21c   : > { %v1450_v7 = vadd.f32 %v1442_v24, %v1292_v4  ;;  %v1594_v6 = vmul.f32 %v1593_v40, %v1551_v30  ;;  %v4220_v47 = vpop.f32.mrb[28].mxu0  ;;  %v1909_v30 = vrot.slane %v5488_v2, %v1908_v38 }
 0x21d   : > { %v1603_v32 = vadd.f32 %v1595_v8, %v1445_v44  ;;  %v1753_v39 = vmul.f32 %v4220_v47, %v1751_v56  ;;  %v1709_v48 = vpop.f32.mrb[29].mxu0 }
 0x21e   : > { %v1602_v37 = vadd.f32 %v1594_v6, %v1444_v46  ;;  %v1752_v3 = vmul.f32 %v1751_v56, %v1709_v48  ;;  %v4195_v55 = vpop.f32.mrb[30].mxu1 }
 0x21f   : > { %v1761_v36 = vadd.f32 %v1753_v39, %v1603_v32  ;;  %v1597_v33 = vmul.f32 %v4195_v55, %v1593_v40  ;;  %v1561_v58 = vpop.f32.mrb[31].mxu1 }
 0x220   : > { %v1760_v62 = vadd.f32 %v1752_v3, %v1602_v37  ;;  %v1596_v13 = vmul.f32 %v1593_v40, %v1561_v58  ;;  %v4223_v16 = vpop.f32.mrb[30].mxu0 }
 0x221   : > { %v1605_v20 = vadd.f32 %v1597_v33, %v1447_v53  ;;  %v1755_v14 = vmul.f32 %v4223_v16, %v1751_v56  ;;  %v1719_v15 = vpop.f32.mrb[31].mxu0 }
 0x222   : > { %v1604_v17 = vadd.f32 %v1596_v13, %v1446_v50  ;;  %v1754_v19 = vmul.f32 %v1751_v56, %v1719_v15  ;;  %v4198_v21 = vpop.f32.mrb[32].mxu1 }
 0x223   : > { %v1763_v43 = vadd.f32 %v1755_v14, %v1605_v20  ;;  %v1599_v23 = vmul.f32 %v4198_v21, %v1593_v40  ;;  %v1571_v44 = vpop.f32.mrb[33].mxu1 }
 0x224   : > { %v1762_v46 = vadd.f32 %v1754_v19, %v1604_v17  ;;  %v1598_v28 = vmul.f32 %v1593_v40, %v1571_v44  ;;  %v4226_v63 = vpop.f32.mrb[32].mxu0 }
 0x225   : > { %v1607_v42 = vadd.f32 %v1599_v23, %v1449_v35  ;;  %v1757_v29 = vmul.f32 %v4226_v63, %v1751_v56  ;;  %v1729_v34 = vpop.f32.mrb[33].mxu0  ;;  %v2067_v35 = vrot.slane %v5488_v2, %v2066_v10 }
 0x226   : > { %v1606_v4 = vadd.f32 %v1598_v28, %v1448_v41  ;;  %v1756_v53 = vmul.f32 %v1751_v56, %v1729_v34  ;;  %v4201_v24 = vpop.f32.mrb[34].mxu1 }
 0x227   : > { %v1765_v27 = vadd.f32 %v1757_v29, %v1607_v42  ;;  %v1601_v50 = vmul.f32 %v4201_v24, %v1593_v40  ;;  %v1581_v8 = vpop.f32.mrb[35].mxu1 }
 0x228   : > { %v1764_v6 = vadd.f32 %v1756_v53, %v1606_v4  ;;  %v1600_v47 = vmul.f32 %v1593_v40, %v1581_v8  ;;  %v4229_v32 = vpop.f32.mrb[34].mxu0 }
 0x229   : > { %v1609_v39 = vadd.f32 %v1601_v50, %v1451_v31  ;;  %v1759_v48 = vmul.f32 %v4229_v32, %v1751_v56  ;;  %v1739_v37 = vpop.f32.mrb[35].mxu0 }
 0x22a   : > { %v1608_v3 = vadd.f32 %v1600_v47, %v1450_v7  ;;  %v1758_v55 = vmul.f32 %v1751_v56, %v1739_v37  ;;  %v4248_v33 = vpop.f32.mrb[36].mxu1 }
 0x22b   : > { %v1767_v59 = vadd.f32 %v1759_v48, %v1609_v39  ;;  %v1911_v41 = vmul.f32 %v4248_v33, %v1909_v30  ;;  %v1867_v58 = vpop.f32.mrb[37].mxu1 }
 0x22c   : > { %v1766_v13 = vadd.f32 %v1758_v55, %v1608_v3  ;;  %v1910_v16 = vmul.f32 %v1909_v30, %v1867_v58  ;;  %v4276_v20 = vpop.f32.mrb[36].mxu0 }
 0x22d   : > { %v1919_v14 = vadd.f32 %v1911_v41, %v1761_v36  ;;  %v2069_v15 = vmul.f32 %v4276_v20, %v2067_v35  ;;  %v2025_v17 = vpop.f32.mrb[37].mxu0  ;;  %v3648_v41 = vld [vmem:[%s5744_s8 + $0x8] ss:$0 sm:$0xff] }
 0x22e   : > { %v1918_v19 = vadd.f32 %v1910_v16, %v1760_v62  ;;  %v2068_v40 = vmul.f32 %v2067_v35, %v2025_v17  ;;  %v4251_v21 = vpop.f32.mrb[38].mxu1 }
 0x22f   : > { %v2077_v31 = vadd.f32 %v2069_v15, %v1919_v14  ;;  %v1913_v23 = vmul.f32 %v4251_v21, %v1909_v30  ;;  %v1877_v44 = vpop.f32.mrb[39].mxu1 }
 0x230   : > { %v2076_v38 = vadd.f32 %v2068_v40, %v1918_v19  ;;  %v1912_v2 = vmul.f32 %v1909_v30, %v1877_v44  ;;  %v4279_v7 = vpop.f32.mrb[38].mxu0 }
 0x231   : > { %v1921_v56 = vadd.f32 %v1913_v23, %v1763_v43  ;;  %v2071_v28 = vmul.f32 %v4279_v7, %v2067_v35  ;;  %v2035_v63 = vpop.f32.mrb[39].mxu0 }
 0x232   : > { %v1920_v42 = vadd.f32 %v1912_v2, %v1762_v46  ;;  %v2070_v29 = vmul.f32 %v2067_v35, %v2035_v63  ;;  %v4254_v34 = vpop.f32.mrb[40].mxu1 }
 0x233   : > { %v2079_v10 = vadd.f32 %v2071_v28, %v1921_v56  ;;  %v1915_v4 = vmul.f32 %v4254_v34, %v1909_v30  ;;  %v1887_v36 = vpop.f32.mrb[41].mxu1 }
 0x234   : > { %v2078_v53 = vadd.f32 %v2070_v29, %v1920_v42  ;;  %v1914_v24 = vmul.f32 %v1909_v30, %v1887_v36  ;;  %v4282_v62 = vpop.f32.mrb[40].mxu0 }
 0x235   : > { %v1923_v50 = vadd.f32 %v1915_v4, %v1765_v27  ;;  %v2073_v8 = vmul.f32 %v4282_v62, %v2067_v35  ;;  %v2045_v47 = vpop.f32.mrb[41].mxu0 }
 0x236   : > { %v1922_v32 = vadd.f32 %v1914_v24, %v1764_v6  ;;  %v2072_v39 = vmul.f32 %v2067_v35, %v2045_v47  ;;  %v4257_v48 = vpop.f32.mrb[42].mxu1 }
 0x237   : > { %v2081_v37 = vadd.f32 %v2073_v8, %v1923_v50  ;;  %v1917_v3 = vmul.f32 %v4257_v48, %v1909_v30  ;;  %v1897_v43 = vpop.f32.mrb[43].mxu1 }
 0x238   : > { %v2080_v55 = vadd.f32 %v2072_v39, %v1922_v32  ;;  %v1916_v33 = vmul.f32 %v1909_v30, %v1897_v43  ;;  %v4285_v46 = vpop.f32.mrb[42].mxu0 }
 0x239   : > { %v1925_v58 = vadd.f32 %v1917_v3, %v1767_v59  ;;  %v2075_v16 = vmul.f32 %v4285_v46, %v2067_v35  ;;  %v2055_v20 = vpop.f32.mrb[43].mxu0 }
 0x23a   : > { %v1924_v14 = vadd.f32 %v1916_v33, %v1766_v13  ;;  %v2074_v27 = vmul.f32 %v2067_v35, %v2055_v20  ;;  %v4304_v15 = vpop.f32.mrb[44].mxu1 }
 0x23b   : > { %v2083_v17 = vadd.f32 %v2075_v16, %v1925_v58  ;;  %v2227_v6 = vmul.f32 %v4304_v15, %v3648_v41  ;;  %v2183_v19 = vpop.f32.mrb[45].mxu1 }
 0x23c   : > { %v2082_v40 = vadd.f32 %v2074_v27, %v1924_v14  ;;  %v2226_v21 = vmul.f32 %v3648_v41, %v2183_v19 }
 0x23d   : > { %v2235_v23 = vadd.f32 %v2227_v6, %v2077_v31 }
 0x23e   : > { %v2234_v44 = vadd.f32 %v2226_v21, %v2076_v38  ;;  %v4307_v2 = vpop.f32.mrb[46].mxu1 }
 0x23f   : > { %v2229_v30 = vmul.f32 %v4307_v2, %v3648_v41  ;;  %v2193_v7 = vpop.f32.mrb[47].mxu1 }
 0x240   : > { %v2228_v56 = vmul.f32 %v3648_v41, %v2193_v7  ;;  %4322 = vmatprep.mubr.msk.f32.mxu0 %vm448_vm0, %v2234_v44 }
 0x241   : > { %v2237_v28 = vadd.f32 %v2229_v30, %v2079_v10  ;;  %4323 = vmatmul.mubr.msk.f32.vlgmr.msra.gmra.mrb[44].mxu0 %vm448_vm0, %v2235_v23 }
 0x242   : > { %v2236_v59 = vadd.f32 %v2228_v56, %v2078_v53  ;;  %4681 = vmatpush3.bf16.msra.mxu0 %v5172_v52  ;;  %v4310_v35 = vpop.f32.mrb[48].mxu1 }
 0x243   : > { %v2231_v13 = vmul.f32 %v4310_v35, %v3648_v41  ;;  %4683 = vmatprep.subr.bf16.mxu0 %v5188_v1  ;;  %v2203_v63 = vpop.f32.mrb[49].mxu1 }
 0x244   : > { %v2230_v42 = vmul.f32 %v3648_v41, %v2203_v63  ;;  %4325 = vmatprep.mubr.msk.f32.mxu0 %vm448_vm0, %v2236_v59 }
 0x245   : > { %v2239_v31 = vadd.f32 %v2231_v13, %v2081_v37  ;;  %4326 = vmatmul.mubr.msk.f32.gmra.mrb[46].mxu0 %vm448_vm0, %v2237_v28 }
 0x246   : > { %v2238_v38 = vadd.f32 %v2230_v42, %v2080_v55  ;;  %4685 = vmatpush3.bf16.msra.mxu0 %v5188_v1  ;;  %v4313_v29 = vpop.f32.mrb[50].mxu1 }
 0x247   : > { %v2233_v34 = vmul.f32 %v4313_v29, %v3648_v41  ;;  %4687 = vmatprep.subr.bf16.mxu0 %v5205_v12  ;;  %v2213_v10 = vpop.f32.mrb[51].mxu1 }
 0x248   : > { %v2232_v52 = vmul.f32 %v3648_v41, %v2213_v10  ;;  %4328 = vmatprep.mubr.msk.f32.mxu0 %vm448_vm0, %v2238_v38 }
 0x249   : > { %v2241_v4 = vadd.f32 %v2233_v34, %v2083_v17  ;;  %4329 = vmatmul.mubr.msk.f32.gmra.mrb[48].mxu0 %vm448_vm0, %v2239_v31 }
 0x24a   : > { %v2240_v36 = vadd.f32 %v2232_v52, %v2082_v40  ;;  %4689 = vmatpush3.bf16.msra.mxu0 %v5205_v12 }
 0x24b   : > { %4691 = vmatprep.subr.bf16.mxu0 %v5226_v26 }
 0x24c   : > { %4331 = vmatprep.mubr.msk.f32.mxu0 %vm448_vm0, %v2240_v36 }
 0x24d   : > { %4332 = vmatmul.mubr.msk.f32.gmra.mrb[50].mxu0 %vm448_vm0, %v2241_v4 }
 0x24e   : > { %4693 = vmatpush3.bf16.msra.mxu0 %v5226_v26 }
 0x24f   : > { %4695 = vmatprep.subr.bf16.mxu0 %v5357_v54 }
 0x25f   : > { %v4352_v1 = vpop.f32.mrb[52].mxu1 }
 0x260   : > { %v2537_v53 = vmul.f32 0.35355338, %v4352_v1  ;;  %v2497_v24 = vpop.f32.mrb[53].mxu1 }
 0x261   : > { %v2536_v62 = vmul.f32 0.35355338, %v2497_v24 }
 0x262   : > { %v2547_v50 = vsel %vm828_vm1, %v2537_v53, -inf }
 0x263   : > { %2548 = vmax.xlane.f32.xlu1 %v2547_v50  ;;  %v4355_v8 = vpop.f32.mrb[54].mxu1  ;;  %v2544_v12 = vsel %vm828_vm1, %v2536_v62, -inf }
 0x264   : > { %2545 = vmax.xlane.f32.xlu0 %v2544_v12  ;;  %v2507_v47 = vpop.f32.mrb[55].mxu1  ;;  %v2539_v39 = vmul.f32 0.35355338, %v4355_v8 }
 0x265   : > { %v2538_v32 = vmul.f32 0.35355338, %v2507_v47 }
 0x266   : > { %v2553_v33 = vsel %vm828_vm1, %v2539_v39, -inf }
 0x267   : > { %v4358_v48 = vpop.f32.mrb[56].mxu1  ;;  %v2550_v37 = vsel %vm828_vm1, %v2538_v32, -inf }
 0x268   : > { %2551 = vmax.xlane.f32.xlu0 %v2550_v37  ;;  %v2517_v26 = vpop.f32.mrb[57].mxu1  ;;  %v2541_v43 = vmul.f32 0.35355338, %v4358_v48 }
 0x269   : > { %v2540_v3 = vmul.f32 0.35355338, %v2517_v26 }
 0x26a   : > { %v2559_v20 = vsel %vm828_vm1, %v2541_v43, -inf }
 0x26b   : > { %v4361_v55 = vpop.f32.mrb[58].mxu1  ;;  %v2556_v46 = vsel %vm828_vm1, %v2540_v3, -inf }
 0x26c   : > { %2554 = vmax.xlane.f32.xlu0 %v2553_v33  ;;  %2557 = vmax.xlane.f32.xlu1 %v2556_v46  ;;  %v2527_v41 = vpop.f32.mrb[59].mxu1  ;;  %v2543_v16 = vmul.f32 0.35355338, %v4361_v55 }
 0x26d   : > { %v2542_v58 = vmul.f32 0.35355338, %v2527_v41 }
 0x26e   : > { %v2565_v27 = vsel %vm828_vm1, %v2543_v16, -inf }
 0x26f   : > { %v2562_v14 = vsel %vm828_vm1, %v2542_v58, -inf }
 0x270   : > { %2560 = vmax.xlane.f32.xlu0 %v2559_v20  ;;  %2563 = vmax.xlane.f32.xlu1 %v2562_v14 }
 0x274   : > { %2566 = vmax.xlane.f32.xlu0 %v2565_v27 }
 0x280   : > { %v4424_v15 = vpop.f32.mrb[60].mxu1 }
 0x281   : > { %v3029_v17 = vpop.f32.mrb[61].mxu1  ;;  %v5575_v14 = vmul.f32 0.35355338, %v4424_v15 }
 0x284   : > { %v5535_v6 = vpop.f32.mrb[62].mxu1 }
 0x285   : > { %v3039_v19 = vpop.f32.mrb[63].mxu1 }
 0x2a7   : > { %v5537_v40 = vpop.f32.mrb[64].mxu1 }
 0x2a8   : > { %v5539_v21 = vpop.f32.mrb[65].mxu1 }
 0x2ab   : > { %v5541_v23 = vpop.f32.mrb[66].mxu1 }
 0x2ac   : > { %v5543_v44 = vpop.f32.mrb[67].mxu1 }
 0x2f0   : > { %v2549_v2 = vpop.xlane.xlu1 %2548 }
 0x2f1   : > { %v2569_v30 = vsub.f32 %v2537_v53, %v2549_v2  ;;  %v2546_v7 = vpop.xlane.xlu0 %2545  ;;  %v5579_v2 = vmul.f32 0.35355338, %v3039_v19  ;;  %v5593_v19 = vmul.f32 0.35355338, %v5537_v40 }
 0x2f2   : > { %v2568_v56 = vsub.f32 %v2536_v62, %v2546_v7  ;;  %v3079_v7 = vsel %vm828_vm1, %v5575_v14, -inf }
 0x2f3   : > { %v2578_v28 = vmul.f32 1.442695, %v2569_v30  ;;  %v3082_v15 = vsel %vm828_vm1, %v5579_v2, -inf }
 0x2f4   : > { %v2576_v59 = vmul.f32 1.442695, %v2568_v56  ;;  %v5588_v56 = vmul.f32 0.35355338, %v5539_v21  ;;  %v5603_v21 = vmul.f32 0.35355338, %v5541_v23 }
 0x2f5   : > { %4833 = vpow2.f32 %v2578_v28  ;;  %v2552_v35 = vpop.xlane.xlu0 %2551 }
 0x2f6   : > { %4835 = vpow2.f32 %v2576_v59  ;;  %v2570_v13 = vsub.f32 %v2538_v32, %v2552_v35  ;;  %v3088_v59 = vsel %vm828_vm1, %v5588_v56, -inf  ;;  %v3091_v35 = vsel %vm828_vm1, %v5593_v19, -inf }
 0x2f8   : > { %v2580_v63 = vmul.f32 1.442695, %v2570_v13 }
 0x2f9   : > { %v2555_v42 = vpop.xlane.xlu0 %2554  ;;  %v2558_v31 = vpop.xlane.xlu1 %2557 }
 0x2fa   : > { %4837 = vpow2.f32 %v2580_v63  ;;  %v2571_v38 = vsub.f32 %v2539_v39, %v2555_v42  ;;  %v2572_v29 = vsub.f32 %v2540_v3, %v2558_v31 }
 0x2fc   : > { %v2582_v34 = vmul.f32 1.442695, %v2571_v38  ;;  %v2584_v10 = vmul.f32 1.442695, %v2572_v29 }
 0x2fd   : > { %v2561_v52 = vpop.xlane.xlu0 %2560  ;;  %v2564_v4 = vpop.xlane.xlu1 %2563 }
 0x2fe   : > { %4839 = vpow2.f32 %v2582_v34  ;;  %v2573_v36 = vsub.f32 %v2541_v43, %v2561_v52  ;;  %v2574_v1 = vsub.f32 %v2542_v58, %v2564_v4  ;;  %v3068_v58 = vmul.f32 0.35355338, %v3029_v17 }
 0x2ff   : > { %v5545_v53 = vpop.eup %4833  ;;  %4841 = vpow2.f32 %v2584_v10  ;;  %v5583_v17 = vmul.f32 0.35355338, %v5535_v6  ;;  %v5598_v6 = vmul.f32 0.35355338, %v5543_v44  ;;  %v3097_v44 = vsel %vm828_vm1, %v5603_v21, -inf }
 0x300   : > { %v5547_v24 = vpop.eup %4835  ;;  %v2586_v62 = vmul.f32 1.442695, %v2573_v36  ;;  %v2588_v50 = vmul.f32 1.442695, %v2574_v1  ;;  %v2595_v8 = vsel %vm828_vm1, %v5545_v53, 0.0  ;;  %v3076_v30 = vsel %vm828_vm1, %v3068_v58, -inf }
 0x301   : > { %2596 = vadd.xlane.f32.xlu0 %v2595_v8  ;;  %v2567_v12 = vpop.xlane.xlu0 %2566  ;;  %v2592_v47 = vsel %vm828_vm1, %v5547_v24, 0.0  ;;  %v3085_v28 = vsel %vm828_vm1, %v5583_v17, -inf  ;;  %v3094_v40 = vsel %vm828_vm1, %v5598_v6, -inf }
 0x302   : > { %4843 = vpow2.f32 %v2586_v62  ;;  %v2575_v32 = vsub.f32 %v2543_v16, %v2567_v12  ;;  %2593 = vadd.xlane.f32.xlu1 %v2592_v47 }
 0x303   : > { %4845 = vpow2.f32 %v2588_v50 }
 0x304   : > { %v5553_v39 = vpop.eup %4837  ;;  %v2590_v48 = vmul.f32 1.442695, %v2575_v32 }
 0x305   : > { %v2598_v37 = vsel %vm828_vm1, %v5553_v39, 0.0 }
 0x306   : > { %4847 = vpow2.f32 %v2590_v48  ;;  %2599 = vadd.xlane.f32.xlu1 %v2598_v37 }
 0x308   : > { %v5557_v26 = vpop.eup %4839 }
 0x309   : > { %v5559_v3 = vpop.eup %4841  ;;  %v2601_v43 = vsel %vm828_vm1, %v5557_v26, 0.0 }
 0x30a   : > { %2602 = vadd.xlane.f32.xlu0 %v2601_v43  ;;  %v2604_v55 = vsel %vm828_vm1, %v5559_v3, 0.0 }
 0x30b   : > { %2605 = vadd.xlane.f32.xlu1 %v2604_v55 }
 0x30c   : > { %v5565_v33 = vpop.eup %4843 }
 0x30d   : > { %v5567_v46 = vpop.eup %4845  ;;  %v2607_v41 = vsel %vm828_vm1, %v5565_v33, 0.0 }
 0x30e   : > { %2608 = vadd.xlane.f32.xlu0 %v2607_v41  ;;  %v2610_v16 = vsel %vm828_vm1, %v5567_v46, 0.0 }
 0x30f   : > { %2611 = vadd.xlane.f32.xlu1 %v2610_v16 }
 0x310   : > { %v5573_v20 = vpop.eup %4847 }
 0x311   : > { %v2613_v27 = vsel %vm828_vm1, %v5573_v20, 0.0 }
 0x312   : > { %2614 = vadd.xlane.f32.xlu0 %v2613_v27 }
 0x313   : > { %3077 = vmax.xlane.f32.xlu1 %v3076_v30 }
 0x316   : > { %3080 = vmax.xlane.f32.xlu0 %v3079_v7 }
 0x317   : > { %3083 = vmax.xlane.f32.xlu1 %v3082_v15 }
 0x31a   : > { %3086 = vmax.xlane.f32.xlu0 %v3085_v28 }
 0x31b   : > { %3089 = vmax.xlane.f32.xlu1 %v3088_v59 }
 0x31e   : > { %3092 = vmax.xlane.f32.xlu0 %v3091_v35 }
 0x31f   : > { %3095 = vmax.xlane.f32.xlu1 %v3094_v40 }
 0x322   : > { %3098 = vmax.xlane.f32.xlu0 %v3097_v44 }
 0x330   : > { %4814 = vrot.lane.b32.xlu1 %v4813_v51, %s4941_s28 }
 0x38e   : > { %v2597_v23 = vpop.xlane.xlu0 %2596 }
 0x38f   : > { %4849 = vrcp.f32 %v2597_v23  ;;  %v2594_v13 = vpop.xlane.xlu1 %2593 }
 0x390   : > { %4851 = vrcp.f32 %v2594_v13 }
 0x393   : > { %v2600_v63 = vpop.xlane.xlu1 %2599 }
 0x394   : > { %4853 = vrcp.f32 %v2600_v63 }
 0x397   : > { %v2603_v42 = vpop.xlane.xlu0 %2602 }
 0x398   : > { %4855 = vrcp.f32 %v2603_v42  ;;  %v2606_v31 = vpop.xlane.xlu1 %2605 }
 0x399   : > { %v4850_v38 = vpop.eup %4849  ;;  %4857 = vrcp.f32 %v2606_v31 }
 0x39a   : > { %v4852_v29 = vpop.eup %4851  ;;  %v2625_v52 = vmul.f32 %v4850_v38, %v5545_v53 }
 0x39b   : > { %v2609_v34 = vpop.xlane.xlu0 %2608  ;;  %v2624_v10 = vmul.f32 %v4852_v29, %v5547_v24 }
 0x39c   : > { %4859 = vrcp.f32 %v2609_v34  ;;  %v2612_v45 = vpop.xlane.xlu1 %2611 }
 0x39d   : > { %4861 = vrcp.f32 %v2612_v45  ;;  %4378 = vmatprep.mubr.msk.f32.mxu0 %vm828_vm1, %v2624_v10 }
 0x39e   : > { %v4854_v49 = vpop.eup %4853  ;;  %4379 = vmatmul.mubr.msk.f32.vlgmr.msra.gmra.mrb[52].mxu0 %vm828_vm1, %v2625_v52 }
 0x39f   : > { %v2615_v51 = vpop.xlane.xlu0 %2614  ;;  %v2626_v4 = vmul.f32 %v4854_v49, %v5553_v39  ;;  %4697 = vmatpush3.bf16.msra.mxu0 %v5357_v54 }
 0x3a0   : > { %4863 = vrcp.f32 %v2615_v51  ;;  %v3078_v36 = vpop.xlane.xlu1 %3077 }
 0x3a1   : > { %v3100_v1 = vsub.f32 %v3068_v58, %v3078_v36  ;;  %4381 = vmatprep.mubr.msk.f32.mxu0 %vm828_vm1, %v2626_v4 }
 0x3a2   : > { %v4856_v24 = vpop.eup %4855 }
 0x3a3   : > { %v4858_v53 = vpop.eup %4857  ;;  %v3108_v62 = vmul.f32 1.442695, %v3100_v1  ;;  %v3081_v50 = vpop.xlane.xlu0 %3080  ;;  %v2627_v8 = vmul.f32 %v4856_v24, %v5557_v26 }
 0x3a4   : > { %v3101_v12 = vsub.f32 %v5575_v14, %v3081_v50  ;;  %v3084_v47 = vpop.xlane.xlu1 %3083  ;;  %v2628_v32 = vmul.f32 %v4858_v53, %v5559_v3 }
 0x3a5   : > { %4865 = vpow2.f32 %v3108_v62  ;;  %v3102_v39 = vsub.f32 %v5579_v2, %v3084_v47  ;;  %4382 = vmatmul.mubr.msk.f32.gmra.mrb[54].mxu0 %vm828_vm1, %v2627_v8 }
 0x3a6   : > { %v4860_v54 = vpop.eup %4859  ;;  %v3110_v48 = vmul.f32 1.442695, %v3101_v12  ;;  %4384 = vmatprep.mubr.msk.f32.mxu0 %vm828_vm1, %v2628_v32 }
 0x3a7   : > { %v4862_v37 = vpop.eup %4861  ;;  %v3112_v43 = vmul.f32 1.442695, %v3102_v39  ;;  %v3087_v55 = vpop.xlane.xlu0 %3086  ;;  %v2629_v41 = vmul.f32 %v4860_v54, %v5565_v33 }
 0x3a8   : > { %4867 = vpow2.f32 %v3110_v48  ;;  %v3103_v26 = vsub.f32 %v5583_v17, %v3087_v55  ;;  %v3090_v58 = vpop.xlane.xlu1 %3089  ;;  %v2630_v3 = vmul.f32 %v4862_v37, %v5567_v46 }
 0x3a9   : > { %4869 = vpow2.f32 %v3112_v43  ;;  %v3104_v16 = vsub.f32 %v5588_v56, %v3090_v58  ;;  %4385 = vmatmul.mubr.msk.f32.gmra.mrb[56].mxu0 %vm828_vm1, %v2629_v41 }
 0x3aa   : > { %v4864_v14 = vpop.eup %4863  ;;  %v3114_v27 = vmul.f32 1.442695, %v3103_v26  ;;  %4387 = vmatprep.mubr.msk.f32.mxu0 %vm828_vm1, %v2630_v3 }
 0x3ab   : > { %v3116_v2 = vmul.f32 1.442695, %v3104_v16  ;;  %v3093_v30 = vpop.xlane.xlu0 %3092  ;;  %v2631_v7 = vmul.f32 %v4864_v14, %v5573_v20 }
 0x3ac   : > { %4871 = vpow2.f32 %v3114_v27  ;;  %v3105_v33 = vsub.f32 %v5593_v19, %v3093_v30  ;;  %v3096_v17 = vpop.xlane.xlu1 %3095 }
 0x3ad   : > { %4873 = vpow2.f32 %v3116_v2  ;;  %4388 = vmatmul.mubr.msk.f32.gmra.mrb[58].mxu0 %vm828_vm1, %v2631_v7  ;;  %v3106_v56 = vsub.f32 %v5598_v6, %v3096_v17 }
 0x3ae   : > { %v3118_v46 = vmul.f32 1.442695, %v3105_v33 }
 0x3af   : > { %v5638_v15 = vpop.eup %4865  ;;  %v3099_v28 = vpop.xlane.xlu0 %3098  ;;  %v3120_v23 = vmul.f32 1.442695, %v3106_v56 }
 0x3b0   : > { %4875 = vpow2.f32 %v3118_v46  ;;  %v3107_v59 = vsub.f32 %v5603_v21, %v3099_v28  ;;  %v4815_v35 = vpop.permute.xlu1 %4814  ;;  %v3124_v20 = vsel %vm828_vm1, %v5638_v15, 0.0 }
 0x3b1   : > { %v4817_v40 = vunpack.i.h.bf16 %v4815_v35  ;;  %v4816_v44 = vunpack.i.l.bf16 %v4815_v35  ;;  %3125 = vadd.xlane.f32.xlu1 %v3124_v20 }
 0x3b2   : > { %v5643_v19 = vpop.eup %4867  ;;  %v3122_v13 = vmul.f32 1.442695, %v3107_v59 }
 0x3b3   : > { %v5645_v63 = vpop.eup %4869  ;;  %v4722_v6 = vpack.c.bf16 %v4817_v40, %v4816_v44  ;;  %v3127_v42 = vsel %vm828_vm1, %v5643_v19, 0.0 }
 0x3b4   : > { %4877 = vpow2.f32 %v3122_v13  ;;  %3128 = vadd.xlane.f32.xlu0 %v3127_v42  ;;  %v3130_v21 = vsel %vm828_vm1, %v5645_v63, 0.0  ;;  %v3649_v42 = vld [vmem:[%s5747_s11] ss:$0 sm:$0xff] }
 0x3b5   : > { %3131 = vadd.xlane.f32.xlu1 %v3130_v21  ;;  %4723 = vmatprep.subr.bf16.mxu0 %v4722_v6  ;;  %4879 = vpow2.f32 %v3120_v23 }
 0x3b6   : > { %v5651_v31 = vpop.eup %4871 }
 0x3b7   : > { %v5653_v38 = vpop.eup %4873  ;;  %v3133_v29 = vsel %vm828_vm1, %v5651_v31, 0.0 }
 0x3b8   : > { %3134 = vadd.xlane.f32.xlu0 %v3133_v29  ;;  %v3136_v34 = vsel %vm828_vm1, %v5653_v38, 0.0 }
 0x3b9   : > { %3137 = vadd.xlane.f32.xlu1 %v3136_v34 }
 0x3ba   : > { %v5659_v10 = vpop.eup %4875 }
 0x3bb   : > { %v3139_v52 = vsel %vm828_vm1, %v5659_v10, 0.0 }
 0x3bc   : > { %3140 = vadd.xlane.f32.xlu0 %v3139_v52 }
 0x3be   : > { %v5663_v45 = vpop.eup %4877 }
 0x3bf   : > { %v3145_v49 = vsel %vm828_vm1, %v5663_v45, 0.0  ;;  %v5667_v51 = vpop.eup %4879 }
 0x3c0   : > { %3146 = vadd.xlane.f32.xlu0 %v3145_v49  ;;  %v3142_v4 = vsel %vm828_vm1, %v5667_v51, 0.0 }
 0x3c4   : > { %3143 = vadd.xlane.f32.xlu0 %v3142_v4 }
 0x3ca   : > { %4824 = vrot.lane.b32.xlu1 %v4823_v11, %s4941_s28 }
 0x3ce   : > { %4829 = vrot.lane.b32.xlu1 %v4828_v25, %s4941_s28 }
 0x3da   : > { %4819 = vrot.lane.b32.xlu0 %v4818_v0, %s4941_s28 }
 0x43e   : > { %v3126_v53 = vpop.xlane.xlu1 %3125 }
 0x43f   : > { %4881 = vrcp.f32 %v3126_v53 }
 0x441   : > { %v3129_v36 = vpop.xlane.xlu0 %3128 }
 0x442   : > { %v3132_v50 = vpop.xlane.xlu1 %3131  ;;  %4883 = vrcp.f32 %v3129_v36 }
 0x443   : > { %4885 = vrcp.f32 %v3132_v50 }
 0x445   : > { %v3135_v1 = vpop.xlane.xlu0 %3134 }
 0x446   : > { %v3138_v12 = vpop.xlane.xlu1 %3137  ;;  %4887 = vrcp.f32 %v3135_v1 }
 0x447   : > { %4889 = vrcp.f32 %v3138_v12 }
 0x449   : > { %v3141_v24 = vpop.xlane.xlu0 %3140  ;;  %v4882_v26 = vpop.eup %4881 }
 0x44a   : > { %v4825_v9 = vpop.permute.xlu1 %4824  ;;  %4891 = vrcp.f32 %v3141_v24  ;;  %v3156_v14 = vmul.f32 %v4882_v26, %v5638_v15 }
 0x44b   : > { %v4827_v25 = vunpack.i.h.bf16 %v4825_v9  ;;  %v4826_v57 = vunpack.i.l.bf16 %v4825_v9 }
 0x44c   : > { %v4884_v16 = vpop.eup %4883 }
 0x44d   : > { %v3147_v62 = vpop.xlane.xlu0 %3146  ;;  %v4730_v32 = vpack.c.bf16 %v4827_v25, %v4826_v57  ;;  %v4886_v27 = vpop.eup %4885  ;;  %v3157_v2 = vmul.f32 %v4884_v16, %v5643_v19 }
 0x44e   : > { %v4830_v0 = vpop.permute.xlu1 %4829  ;;  %v3158_v7 = vmul.f32 %v4886_v27, %v5645_v63 }
 0x44f   : > { %v4832_v39 = vunpack.i.h.bf16 %v4830_v0  ;;  %v4831_v54 = vunpack.i.l.bf16 %v4830_v0 }
 0x450   : > { %v4888_v30 = vpop.eup %4887 }
 0x451   : > { %v3144_v8 = vpop.xlane.xlu0 %3143  ;;  %v4734_v43 = vpack.c.bf16 %v4832_v39, %v4831_v54  ;;  %v4890_v33 = vpop.eup %4889  ;;  %v3159_v17 = vmul.f32 %v4888_v30, %v5651_v31 }
 0x452   : > { %4893 = vrcp.f32 %v3144_v8  ;;  %v3160_v56 = vmul.f32 %v4890_v33, %v5653_v38 }
 0x453   : > { %4895 = vrcp.f32 %v3147_v62 }
 0x454   : > { %v4892_v46 = vpop.eup %4891 }
 0x455   : > { %v4820_v5 = vpop.permute.xlu0 %4819  ;;  %v3161_v28 = vmul.f32 %v4892_v46, %v5659_v10 }
 0x456   : > { %v4822_v11 = vunpack.i.h.bf16 %v4820_v5  ;;  %v4821_v47 = vunpack.i.l.bf16 %v4820_v5 }
 0x458   : > { %v4726_v61 = vpack.c.bf16 %v4822_v11, %v4821_v47 }
 0x45c   : > { %v4894_v15 = vpop.eup %4893 }
 0x45d   : > { %v4896_v59 = vpop.eup %4895  ;;  %v3162_v35 = vmul.f32 %v4894_v15, %v5667_v51 }
 0x471   : > { %v4380_v18 = vpop.f32.mrb[52].mxu0 }
 0x472   : > { %v2722_v22 = vpop.f32.mrb[53].mxu0 }
 0x473   : > { %4394 = vmatprep.mubr.msk.f32.mxu0 %vm2761_vm4, %v2722_v22 }
 0x474   : > { %4395 = vmatmul.mubr.msk.f32.vlgmr.msra.gmra.mrb[44].mxu0 %vm2761_vm4, %v4380_v18 }
 0x475   : > { %4725 = vmatpush3.bf16.msra.mxu0 %v4722_v6 }
 0x476   : > { %4727 = vmatprep.subr.bf16.mxu0 %v4726_v61 }
 0x478   : > { %v4383_v48 = vpop.f32.mrb[54].mxu0 }
 0x479   : > { %4729 = vmatpush3.bf16.msra.mxu0 %v4726_v61  ;;  %v2732_v37 = vpop.f32.mrb[55].mxu0 }
 0x47a   : > { %4731 = vmatprep.subr.bf16.mxu0 %v4730_v32  ;;  %4397 = vmatprep.mubr.msk.f32.mxu0 %vm2761_vm4, %v2732_v37 }
 0x47b   : > { %4398 = vmatmul.mubr.msk.f32.gmra.mrb[46].mxu0 %vm2761_vm4, %v4383_v48 }
 0x47c   : > { %v4386_v55 = vpop.f32.mrb[56].mxu0 }
 0x47d   : > { %4733 = vmatpush3.bf16.msra.mxu0 %v4730_v32  ;;  %v2742_v41 = vpop.f32.mrb[57].mxu0 }
 0x47e   : > { %4735 = vmatprep.subr.bf16.mxu0 %v4734_v43  ;;  %4400 = vmatprep.mubr.msk.f32.mxu0 %vm2761_vm4, %v2742_v41 }
 0x47f   : > { %4401 = vmatmul.mubr.msk.f32.gmra.mrb[48].mxu0 %vm2761_vm4, %v4386_v55 }
 0x480   : > { %v4389_v58 = vpop.f32.mrb[58].mxu0 }
 0x481   : > { %4737 = vmatpush3.bf16.msra.mxu0 %v4734_v43  ;;  %v2752_v3 = vpop.f32.mrb[59].mxu0 }
 0x482   : > { %4403 = vmatprep.mubr.msk.f32.mxu0 %vm2761_vm4, %v2752_v3  ;;  %4739 = vmatprep.subr.bf16.mxu0 %v5371_v60 }
 0x483   : > { %4404 = vmatmul.mubr.msk.f32.gmra.mrb[50].mxu0 %vm2761_vm4, %v4389_v58 }
 0x484   : > { %4450 = vmatprep.mubr.msk.f32.mxu0 %vm828_vm1, %v3156_v14 }
 0x487   : > { %4451 = vmatmul.mubr.msk.f32.vlgmr.msra.gmra.mrb[60].mxu0 %vm828_vm1, %v3157_v2 }
 0x488   : > { %4453 = vmatprep.mubr.msk.f32.mxu0 %vm828_vm1, %v3158_v7  ;;  %4741 = vmatpush3.bf16.msra.mxu0 %v5371_v60  ;;  %v3163_v60 = vmul.f32 %v4896_v59, %v5663_v45 }
 0x48b   : > { %4454 = vmatmul.mubr.msk.f32.gmra.mrb[62].mxu0 %vm828_vm1, %v3159_v17 }
 0x48c   : > { %4456 = vmatprep.mubr.msk.f32.mxu0 %vm828_vm1, %v3160_v56 }
 0x48f   : > { %4457 = vmatmul.mubr.msk.f32.gmra.mrb[64].mxu0 %vm828_vm1, %v3161_v28 }
 0x490   : > { %4459 = vmatprep.mubr.msk.f32.mxu0 %vm828_vm1, %v3162_v35 }
 0x493   : > { %4460 = vmatmul.mubr.msk.f32.gmra.mrb[66].mxu0 %vm828_vm1, %v3163_v60 }
 0x55a   : > { %v4452_v20 = vpop.f32.mrb[60].mxu0 }
 0x55b   : > { %v3286_v40 = vpop.f32.mrb[61].mxu0 }
 0x55c   : > { %4466 = vmatprep.mubr.msk.f32.mxu0 %vm2761_vm4, %v3286_v40 }
 0x55d   : > { %4467 = vmatmul.mubr.msk.f32.vlgmr.msra.gmra.mrb[44].mxu0 %vm2761_vm4, %v4452_v20 }
 0x55e   : > { %v4455_v44 = vpop.f32.mrb[62].mxu0 }
 0x55f   : > { %v3296_v19 = vpop.f32.mrb[63].mxu0 }
 0x560   : > { %4469 = vmatprep.mubr.msk.f32.mxu0 %vm2761_vm4, %v3296_v19 }
 0x561   : > { %4470 = vmatmul.mubr.msk.f32.gmra.mrb[46].mxu0 %vm2761_vm4, %v4455_v44 }
 0x562   : > { %v4458_v23 = vpop.f32.mrb[64].mxu0 }
 0x563   : > { %v3306_v13 = vpop.f32.mrb[65].mxu0 }
 0x564   : > { %4472 = vmatprep.mubr.msk.f32.mxu0 %vm2761_vm4, %v3306_v13 }
 0x565   : > { %4473 = vmatmul.mubr.msk.f32.gmra.mrb[48].mxu0 %vm2761_vm4, %v4458_v23 }
 0x566   : > { %v4461_v63 = vpop.f32.mrb[66].mxu0 }
 0x567   : > { %v3316_v6 = vpop.f32.mrb[67].mxu0 }
 0x568   : > { %4475 = vmatprep.mubr.msk.f32.mxu0 %vm2761_vm4, %v3316_v6 }
 0x569   : > { %4476 = vmatmul.mubr.msk.f32.gmra.mrb[50].mxu0 %vm2761_vm4, %v4461_v63 }
 0x630   : > { %v4468_v21 = vpop.f32.mrb[44].mxu0 }
 0x631   : > { %v4746_v31 = vadd.f32 %v4468_v21, %v3649_v42  ;;  %v3415_v38 = vpop.f32.mrb[45].mxu0 }
 0x632   : > { %v4747_v29 = vadd.f32 %v3649_v42, %v3415_v38 }
 0x633   : > { %3463 = vst.msk [vmem:[%s428_s15 + $0x8] sm:$0xff] %vm448_vm0, %v4746_v31 }
 0x634   : > { %3462 = vst.msk [vmem:[%s428_s15] sm:$0xff] %vm448_vm0, %v4747_v29  ;;  %v4471_v34 = vpop.f32.mrb[46].mxu0 }
 0x635   : > { %v4748_v10 = vadd.f32 %v4471_v34, %v3649_v42  ;;  %v3425_v52 = vpop.f32.mrb[47].mxu0 }
 0x636   : > { %v4749_v45 = vadd.f32 %v3649_v42, %v3425_v52 }
 0x637   : > { %3465 = vst.msk [vmem:[%s428_s15 + $0x18] sm:$0xff] %vm448_vm0, %v4748_v10 }
 0x638   : > { %3464 = vst.msk [vmem:[%s428_s15 + $0x10] sm:$0xff] %vm448_vm0, %v4749_v45  ;;  %v4474_v49 = vpop.f32.mrb[48].mxu0 }
 0x639   : > { %v4750_v51 = vadd.f32 %v4474_v49, %v3649_v42  ;;  %v3435_v4 = vpop.f32.mrb[49].mxu0 }
 0x63a   : > { %v4751_v36 = vadd.f32 %v3649_v42, %v3435_v4 }
 0x63b   : > { %3467 = vst.msk [vmem:[%s428_s15 + $0x28] sm:$0xff] %vm448_vm0, %v4750_v51 }
 0x63c   : > { %3466 = vst.msk [vmem:[%s428_s15 + $0x20] sm:$0xff] %vm448_vm0, %v4751_v36  ;;  %v4477_v1 = vpop.f32.mrb[50].mxu0 }
 0x63d   : > { %v4752_v24 = vadd.f32 %v4477_v1, %v3649_v42  ;;  %v3445_v53 = vpop.f32.mrb[51].mxu0 }
 0x63e   : > { %v4753_v62 = vadd.f32 %v3649_v42, %v3445_v53 }
 0x63f   : > { %3469 = vst.msk [vmem:[%s428_s15 + $0x38] sm:$0xff] %vm448_vm0, %v4752_v24 }
 0x640   : > { %3468 = vst.msk [vmem:[%s428_s15 + $0x30] sm:$0xff] %vm448_vm0, %v4753_v62 }
 0x641 PF: > { %s23_s21 = sadd.s32 1, %s4935_s21  }
 0x642   : > { %p20_p3 = scmp.ge.s32.totalorder %s23_s21, 4  }
 0x644   :  { %22 = sbr.rel (!%p20_p3) target bundleno = 1 (0x1), region = 111 }
 0x64b   :  { %3491 = vsyncpa [#allocation3], 1 }
 0x64c   :  { %3493 = vsyncpa [#allocation3 + $0x1], 1 }

</bundles_post_ra>
